<compile_context>
chip_gen: v6e
topology: v6e:2x2x1
jax: 0.10.0
libtpu: 0.0.40
codegen_flags: <defaults>
</compile_context>

<pallas_src>
import jax
import jax.numpy as jnp
from jax.experimental import pallas as pl
from jax.experimental.pallas import tpu as pltpu


def _self_attention_kernel(xq_ref, xk_ref, a_ref, w_ref, wv_ref, bv_ref, gamma_ref,
                           o_ref, q_scr, m_scr, l_scr, acc_scr):
    # xq_ref: (C, TQ) query-side slab of x, xk_ref: (C, TK) kv-side slab (same batch element).
    kj = pl.program_id(2)

    @pl.when(kj == 0)
    def _init():
        # Cache q_scr = x_q^T @ A once per query tile (A = Wq^T Wk already folded in wrapper).
        xq_t = jnp.transpose(xq_ref[...]).astype(jnp.bfloat16)             # (TQ, C)
        q_scr[...] = jnp.dot(xq_t, a_ref[...],
                             preferred_element_type=jnp.float32).astype(jnp.bfloat16)
        m_scr[...] = jnp.full_like(m_scr, -jnp.inf)
        l_scr[...] = jnp.zeros_like(l_scr)
        acc_scr[...] = jnp.zeros_like(acc_scr)

    xk = xk_ref[...].astype(jnp.bfloat16)                                  # (C, TK)

    # Scores for this (query tile, kv tile) block:
    #   s[i, j] = x_i^T (Wq^T Wk) x_j + (Wk^T bq) . x_j      (row-constant terms dropped)
    s = jnp.dot(q_scr[...], xk, preferred_element_type=jnp.float32)        # (TQ, TK)
    s = s + jnp.dot(w_ref[...], xk, preferred_element_type=jnp.float32)    # + (1, TK) bias

    # Online softmax update (f32).
    m_prev = m_scr[...]
    m_new = jnp.maximum(m_prev, jnp.max(s, axis=-1, keepdims=True))        # (TQ, 1)
    alpha = jnp.exp(m_prev - m_new)                                        # (TQ, 1)
    p = jnp.exp(s - m_new)                                                 # (TQ, TK)
    l_scr[...] = alpha * l_scr[...] + jnp.sum(p, axis=-1, keepdims=True)
    m_scr[...] = m_new

    # Value projection for this kv tile: vp = Wv @ x_k + bv                (C, TK)
    vp = (jnp.dot(wv_ref[...], xk, preferred_element_type=jnp.float32)
          + bv_ref[...]).astype(jnp.bfloat16)

    # acc[i, c] += sum_j p[i, j] * vp[c, j]   (trans_b matmul: bf16 in, f32 accumulate)
    acc_scr[...] = alpha * acc_scr[...] + jax.lax.dot_general(
        p.astype(jnp.bfloat16), vp,
        dimension_numbers=(((1,), (1,)), ((), ())),
        preferred_element_type=jnp.float32)                                # (TQ, C)

    @pl.when(kj == pl.num_programs(2) - 1)
    def _finalize():
        inv_l = pl.reciprocal(l_scr[...], approx=True)                     # (TQ, 1)
        out_cq = jnp.transpose(acc_scr[...] * inv_l)                       # (C, TQ)
        o_ref[...] = (gamma_ref[0, 0] * out_cq + xq_ref[...]).astype(o_ref.dtype)


def _pick_tile(n, candidates):
    for t in candidates:
        if t <= n and n % t == 0:
            return t
    return n


def self_attention(x_nchw, wq, bq, wk, bk, wv, bv, gamma, *, tq=None, tk=None):
    """SelfAttention forward.

    x_nchw: (B, C, H, W) f32.  wq/wk: (C//8, C), bq/bk: (C//8,), wv: (C, C), bv: (C,),
    gamma: scalar (shape () or (1,)).  Returns (B, C, H, W) f32.
    Note: bk only shifts every softmax row by a constant, so it drops out of the output.
    """
    B, C, H, W = x_nchw.shape
    N = H * W
    x_cn = x_nchw.reshape(B, C, N)          # channel-major; reshape only, no HBM transpose

    if tq is None:
        tq = _pick_tile(N, (256, 128))      # v7x-friendly defaults (64 MiB VMEM / 2 TC)
    if tk is None:
        tk = _pick_tile(N, (512, 256, 128))
    assert N % tq == 0 and N % tk == 0, (N, tq, tk)

    f32 = jnp.float32
    # Fold the q/k projections:  A = Wq^T Wk  (C, C),   w = Wk^T bq  (1, C).
    a_cc = (wq.astype(f32).T @ wk.astype(f32)).astype(jnp.bfloat16)
    w_row = (bq.astype(f32) @ wk.astype(f32)).reshape(1, C).astype(jnp.bfloat16)
    wv_cc = wv.astype(jnp.bfloat16)
    bv_c1 = bv.astype(f32).reshape(C, 1)
    gamma_s = jnp.asarray(gamma, f32).reshape(1, 1)

    grid = (B, N // tq, N // tk)
    out_cn = pl.pallas_call(
        _self_attention_kernel,
        out_shape=jax.ShapeDtypeStruct((B, C, N), f32),
        grid_spec=pltpu.PrefetchScalarGridSpec(
            num_scalar_prefetch=0,
            grid=grid,
            in_specs=[
                pl.BlockSpec((None, C, tq), lambda b, qi, kj: (b, 0, qi)),   # x, query side
                pl.BlockSpec((None, C, tk), lambda b, qi, kj: (b, 0, kj)),   # x, kv side
                pl.BlockSpec((C, C), lambda b, qi, kj: (0, 0)),              # A = Wq^T Wk
                pl.BlockSpec((1, C), lambda b, qi, kj: (0, 0)),              # w = Wk^T bq
                pl.BlockSpec((C, C), lambda b, qi, kj: (0, 0)),              # Wv
                pl.BlockSpec((C, 1), lambda b, qi, kj: (0, 0)),              # bv
                pl.BlockSpec(memory_space=pltpu.MemorySpace.SMEM),           # gamma (scalar)
            ],
            out_specs=pl.BlockSpec((None, C, tq), lambda b, qi, kj: (b, 0, qi)),
            scratch_shapes=[
                pltpu.VMEM((tq, C), jnp.bfloat16),   # q rows @ A, cached per query tile
                pltpu.VMEM((tq, 1), f32),            # running max
                pltpu.VMEM((tq, 1), f32),            # running sum
                pltpu.VMEM((tq, C), f32),            # output accumulator
            ],
        ),
        compiler_params=pltpu.CompilerParams(
            dimension_semantics=("parallel", "parallel", "arbitrary")),
    )(x_cn, x_cn, a_cc, w_row, wv_cc, bv_c1, gamma_s)

    return out_cn.reshape(B, C, H, W)


def _reference(x, wq, bq, wk, bk, wv, bv, gamma):
    """Pure-JAX f32 reference matching the PyTorch module."""
    B, C, H, W = x.shape
    N = H * W
    xf = x.reshape(B, C, N).astype(jnp.float32)
    q = jnp.einsum('oc,bcn->bon', wq, xf) + bq[None, :, None]
    k = jnp.einsum('oc,bcn->bon', wk, xf) + bk[None, :, None]
    v = jnp.einsum('oc,bcn->bon', wv, xf) + bv[None, :, None]
    attn = jax.nn.softmax(jnp.einsum('bci,bcj->bij', q, k), axis=-1)
    out = jnp.einsum('bcj,bij->bci', v, attn)
    g = jnp.asarray(gamma, jnp.float32).reshape(())
    return (g * out + xf).reshape(B, C, H, W)


if __name__ == "__main__":
    # Small shapes: in_channels must be >= 8 so that C // 8 >= 1.  N = 256 so tq = tk = 128
    # exercises both the query-tile axis and multi-step online softmax over kv tiles.
    B, C, H, W = 2, 16, 16, 16
    C8 = C // 8

    key = jax.random.PRNGKey(0)
    kx, kq, kbq, kk, kbk, kv, kbv = jax.random.split(key, 7)

    x = jax.random.normal(kx, (B, C, H, W), dtype=jnp.float32)
    wq = 0.1 * jax.random.normal(kq, (C8, C), dtype=jnp.float32)
    bq = 0.1 * jax.random.normal(kbq, (C8,), dtype=jnp.float32)
    wk = 0.1 * jax.random.normal(kk, (C8, C), dtype=jnp.float32)
    bk = 0.1 * jax.random.normal(kbk, (C8,), dtype=jnp.float32)
    wv = 0.1 * jax.random.normal(kv, (C, C), dtype=jnp.float32)
    bv = 0.1 * jax.random.normal(kbv, (C,), dtype=jnp.float32)
    # The module initializes gamma to zero; use a nonzero value here so the attention path is
    # actually exercised (any learned value is valid at inference time).
    gamma = jnp.asarray([0.5], dtype=jnp.float32)

    out = self_attention(x, wq, bq, wk, bk, wv, bv, gamma, tq=128, tk=128)
    jax.block_until_ready(out)
    assert out.shape == (B, C, H, W)

    ref = _reference(x, wq, bq, wk, bk, wv, bv, gamma)
    max_err = float(jnp.max(jnp.abs(out - ref)))
    assert max_err < 3e-2, f"max abs err {max_err}"
    print("KERNEL_OK")
</pallas_src>

<mosaic_0001>
module attributes {stable_mosaic.version = 11 : i64} {
  func.func @_self_attention_kernel(%arg0: i32, %arg1: i32, %arg2: i32, %arg3: memref<1x16x128xf32, #tpu.memory_space<vmem>>, %arg4: memref<1x16x128xf32, #tpu.memory_space<vmem>>, %arg5: memref<16x16xbf16, #tpu.memory_space<vmem>>, %arg6: memref<1x16xbf16, #tpu.memory_space<vmem>>, %arg7: memref<16x16xbf16, #tpu.memory_space<vmem>>, %arg8: memref<16x1xf32, #tpu.memory_space<vmem>>, %arg9: memref<1x1xf32, #tpu.memory_space<smem>>, %arg10: memref<1x16x128xf32, #tpu.memory_space<vmem>>, %arg11: memref<128x16xbf16, #tpu.memory_space<vmem>>, %arg12: memref<128x1xf32, #tpu.memory_space<vmem>>, %arg13: memref<128x1xf32, #tpu.memory_space<vmem>>, %arg14: memref<128x16xf32, #tpu.memory_space<vmem>>) attributes {dimension_semantics = [#tpu.dimension_semantics<parallel>, #tpu.dimension_semantics<parallel>, #tpu.dimension_semantics<arbitrary>], iteration_bounds = array<i64: 2, 2, 2>, scalar_prefetch = 0 : i64, scratch_operands = 4 : i64, tpu.core_type = #tpu.core_type<tc>, window_params = [{transform_indices = @transform_0, window_bounds = array<i64: 1, 16, 128>}, {transform_indices = @transform_1, window_bounds = array<i64: 1, 16, 128>}, {pipeline_mode = #tpu.pipeline_mode<synchronous>, transform_indices = @transform_2, window_bounds = array<i64: 16, 16>}, {pipeline_mode = #tpu.pipeline_mode<synchronous>, transform_indices = @transform_3, window_bounds = array<i64: 1, 16>}, {pipeline_mode = #tpu.pipeline_mode<synchronous>, transform_indices = @transform_4, window_bounds = array<i64: 16, 16>}, {pipeline_mode = #tpu.pipeline_mode<synchronous>, transform_indices = @transform_5, window_bounds = array<i64: 16, 1>}, {transform_indices = @transform_6, window_bounds = array<i64: 1, 1>}, {transform_indices = @transform_7, window_bounds = array<i64: 1, 16, 128>}]} {
    %c0_i32 = arith.constant 0 : i32
    %0 = arith.cmpi eq, %arg2, %c0_i32 : i32
    %1 = arith.extui %0 : i1 to i32
    %c0_i32_0 = arith.constant 0 : i32
    %2 = arith.cmpi ne, %1, %c0_i32_0 : i32
    scf.if %2 {
      %c0_29 = arith.constant 0 : index
      %c0_30 = arith.constant 0 : index
      %c0_31 = arith.constant 0 : index
      %44 = vector.load %arg3[%c0_29, %c0_30, %c0_31] : memref<1x16x128xf32, #tpu.memory_space<vmem>>, vector<1x16x128xf32>
      %45 = vector.shape_cast %44 : vector<1x16x128xf32> to vector<16x128xf32>
      %46 = tpu.transpose %45, [1, 0] : vector<16x128xf32> -> vector<128x16xf32>
      %47 = arith.truncf %46 : vector<128x16xf32> to vector<128x16xbf16>
      %c0_32 = arith.constant 0 : index
      %c0_33 = arith.constant 0 : index
      %48 = vector.load %arg5[%c0_32, %c0_33] : memref<16x16xbf16, #tpu.memory_space<vmem>>, vector<16x16xbf16>
      %cst_34 = arith.constant dense<0.000000e+00> : vector<128x16xf32>
      %49 = tpu.matmul %47, %48, %cst_34 {dimension_numbers = #tpu.dot_dimension_numbers<[1], [0], [0], [1], [0, 0, 1, 1], [], []>} : vector<128x16xbf16>, vector<16x16xbf16>, vector<128x16xf32> -> vector<128x16xf32>
      %50 = arith.truncf %49 : vector<128x16xf32> to vector<128x16xbf16>
      %c0_35 = arith.constant 0 : index
      %c0_36 = arith.constant 0 : index
      %51 = vector.load %arg11[%c0_35, %c0_36] : memref<128x16xbf16, #tpu.memory_space<vmem>>, vector<128x16xbf16>
      tpu.vector_store %arg11[%c0_35, %c0_36], %50 {strides = array<i32>} : memref<128x16xbf16, #tpu.memory_space<vmem>>, vector<128x16xbf16>,
      %cst_37 = arith.constant 0xFF800000 : f32
      %52 = vector.broadcast %cst_37 : f32 to vector<128x1xf32>
      %c0_38 = arith.constant 0 : index
      %c0_39 = arith.constant 0 : index
      %53 = vector.load %arg12[%c0_38, %c0_39] : memref<128x1xf32, #tpu.memory_space<vmem>>, vector<128x1xf32>
      tpu.vector_store %arg12[%c0_38, %c0_39], %52 {strides = array<i32>} : memref<128x1xf32, #tpu.memory_space<vmem>>, vector<128x1xf32>,
      %cst_40 = arith.constant 0.000000e+00 : f32
      %54 = vector.broadcast %cst_40 : f32 to vector<128x1xf32>
      %c0_41 = arith.constant 0 : index
      %c0_42 = arith.constant 0 : index
      %55 = vector.load %arg13[%c0_41, %c0_42] : memref<128x1xf32, #tpu.memory_space<vmem>>, vector<128x1xf32>
      tpu.vector_store %arg13[%c0_41, %c0_42], %54 {strides = array<i32>} : memref<128x1xf32, #tpu.memory_space<vmem>>, vector<128x1xf32>,
      %cst_43 = arith.constant 0.000000e+00 : f32
      %56 = vector.broadcast %cst_43 : f32 to vector<128x16xf32>
      %c0_44 = arith.constant 0 : index
      %c0_45 = arith.constant 0 : index
      %57 = vector.load %arg14[%c0_44, %c0_45] : memref<128x16xf32, #tpu.memory_space<vmem>>, vector<128x16xf32>
      tpu.vector_store %arg14[%c0_44, %c0_45], %56 {strides = array<i32>} : memref<128x16xf32, #tpu.memory_space<vmem>>, vector<128x16xf32>,
    } else {
    }
    %c0 = arith.constant 0 : index
    %c0_1 = arith.constant 0 : index
    %c0_2 = arith.constant 0 : index
    %3 = vector.load %arg4[%c0, %c0_1, %c0_2] : memref<1x16x128xf32, #tpu.memory_space<vmem>>, vector<1x16x128xf32>
    %4 = vector.shape_cast %3 : vector<1x16x128xf32> to vector<16x128xf32>
    %5 = arith.truncf %4 : vector<16x128xf32> to vector<16x128xbf16>
    %c0_3 = arith.constant 0 : index
    %c0_4 = arith.constant 0 : index
    %6 = vector.load %arg11[%c0_3, %c0_4] : memref<128x16xbf16, #tpu.memory_space<vmem>>, vector<128x16xbf16>
    %cst = arith.constant dense<0.000000e+00> : vector<128x128xf32>
    %7 = tpu.matmul %6, %5, %cst {dimension_numbers = #tpu.dot_dimension_numbers<[1], [0], [0], [1], [0, 0, 1, 1], [], []>} : vector<128x16xbf16>, vector<16x128xbf16>, vector<128x128xf32> -> vector<128x128xf32>
    %c0_5 = arith.constant 0 : index
    %c0_6 = arith.constant 0 : index
    %8 = vector.load %arg6[%c0_5, %c0_6] : memref<1x16xbf16, #tpu.memory_space<vmem>>, vector<1x16xbf16>
    %cst_7 = arith.constant dense<0.000000e+00> : vector<1x128xf32>
    %9 = tpu.matmul %8, %5, %cst_7 {dimension_numbers = #tpu.dot_dimension_numbers<[1], [0], [0], [1], [0, 0, 1, 1], [], []>} : vector<1x16xbf16>, vector<16x128xbf16>, vector<1x128xf32> -> vector<1x128xf32>
    %10 = vector.broadcast %9 : vector<1x128xf32> to vector<128x128xf32>
    %11 = arith.addf %7, %10 : vector<128x128xf32>
    %c0_8 = arith.constant 0 : index
    %c0_9 = arith.constant 0 : index
    %12 = vector.load %arg12[%c0_8, %c0_9] : memref<128x1xf32, #tpu.memory_space<vmem>>, vector<128x1xf32>
    %cst_10 = arith.constant dense<0xFF800000> : vector<128xf32>
    %13 = vector.multi_reduction <maximumf>, %11, %cst_10 [1] : vector<128x128xf32> to vector<128xf32>
    %14 = vector.shape_cast %13 : vector<128xf32> to vector<128x1xf32>
    %15 = arith.maximumf %12, %14 : vector<128x1xf32>
    %16 = arith.subf %12, %15 : vector<128x1xf32>
    %17 = math.exp %16 : vector<128x1xf32>
    %18 = vector.broadcast %15 : vector<128x1xf32> to vector<128x128xf32>
    %19 = arith.subf %11, %18 : vector<128x128xf32>
    %20 = math.exp %19 : vector<128x128xf32>
    %c0_11 = arith.constant 0 : index
    %c0_12 = arith.constant 0 : index
    %21 = vector.load %arg13[%c0_11, %c0_12] : memref<128x1xf32, #tpu.memory_space<vmem>>, vector<128x1xf32>
    %22 = arith.mulf %17, %21 : vector<128x1xf32>
    %cst_13 = arith.constant dense<0.000000e+00> : vector<128xf32>
    %23 = vector.multi_reduction <add>, %20, %cst_13 [1] : vector<128x128xf32> to vector<128xf32>
    %24 = vector.shape_cast %23 : vector<128xf32> to vector<128x1xf32>
    %25 = arith.addf %22, %24 : vector<128x1xf32>
    %c0_14 = arith.constant 0 : index
    %c0_15 = arith.constant 0 : index
    %26 = vector.load %arg13[%c0_14, %c0_15] : memref<128x1xf32, #tpu.memory_space<vmem>>, vector<128x1xf32>
    tpu.vector_store %arg13[%c0_14, %c0_15], %25 {strides = array<i32>} : memref<128x1xf32, #tpu.memory_space<vmem>>, vector<128x1xf32>,
    %c0_16 = arith.constant 0 : index
    %c0_17 = arith.constant 0 : index
    %27 = vector.load %arg12[%c0_16, %c0_17] : memref<128x1xf32, #tpu.memory_space<vmem>>, vector<128x1xf32>
    tpu.vector_store %arg12[%c0_16, %c0_17], %15 {strides = array<i32>} : memref<128x1xf32, #tpu.memory_space<vmem>>, vector<128x1xf32>,
    %c0_18 = arith.constant 0 : index
    %c0_19 = arith.constant 0 : index
    %28 = vector.load %arg7[%c0_18, %c0_19] : memref<16x16xbf16, #tpu.memory_space<vmem>>, vector<16x16xbf16>
    %cst_20 = arith.constant dense<0.000000e+00> : vector<16x128xf32>
    %29 = tpu.matmul %28, %5, %cst_20 {dimension_numbers = #tpu.dot_dimension_numbers<[1], [0], [0], [1], [0, 0, 1, 1], [], []>} : vector<16x16xbf16>, vector<16x128xbf16>, vector<16x128xf32> -> vector<16x128xf32>
    %c0_21 = arith.constant 0 : index
    %c0_22 = arith.constant 0 : index
    %30 = vector.load %arg8[%c0_21, %c0_22] : memref<16x1xf32, #tpu.memory_space<vmem>>, vector<16x1xf32>
    %31 = vector.broadcast %30 : vector<16x1xf32> to vector<16x128xf32>
    %32 = arith.addf %29, %31 : vector<16x128xf32>
    %33 = arith.truncf %32 : vector<16x128xf32> to vector<16x128xbf16>
    %c0_23 = arith.constant 0 : index
    %c0_24 = arith.constant 0 : index
    %34 = vector.load %arg14[%c0_23, %c0_24] : memref<128x16xf32, #tpu.memory_space<vmem>>, vector<128x16xf32>
    %35 = vector.broadcast %17 : vector<128x1xf32> to vector<128x16xf32>
    %36 = arith.mulf %35, %34 : vector<128x16xf32>
    %37 = arith.truncf %20 : vector<128x128xf32> to vector<128x128xbf16>
    %cst_25 = arith.constant dense<0.000000e+00> : vector<128x16xf32>
    %38 = tpu.matmul %37, %33, %cst_25 {dimension_numbers = #tpu.dot_dimension_numbers<[1], [1], [0], [0], [0, 0, 1, 0], [], []>} : vector<128x128xbf16>, vector<16x128xbf16>, vector<128x16xf32> -> vector<128x16xf32>
    %39 = arith.addf %36, %38 : vector<128x16xf32>
    %c0_26 = arith.constant 0 : index
    %c0_27 = arith.constant 0 : index
    %40 = vector.load %arg14[%c0_26, %c0_27] : memref<128x16xf32, #tpu.memory_space<vmem>>, vector<128x16xf32>
    tpu.vector_store %arg14[%c0_26, %c0_27], %39 {strides = array<i32>} : memref<128x16xf32, #tpu.memory_space<vmem>>, vector<128x16xf32>,
    %c1_i32 = arith.constant 1 : i32
    %41 = arith.cmpi eq, %arg2, %c1_i32 : i32
    %42 = arith.extui %41 : i1 to i32
    %c0_i32_28 = arith.constant 0 : i32
    %43 = arith.cmpi ne, %42, %c0_i32_28 : i32
    scf.if %43 {
      %c0_29 = arith.constant 0 : index
      %c0_30 = arith.constant 0 : index
      %44 = vector.load %arg13[%c0_29, %c0_30] : memref<128x1xf32, #tpu.memory_space<vmem>>, vector<128x1xf32>
      %45 = tpu.reciprocal %44 {approx = true} : vector<128x1xf32> -> vector<128x1xf32>
      %c0_31 = arith.constant 0 : index
      %c0_32 = arith.constant 0 : index
      %46 = vector.load %arg14[%c0_31, %c0_32] : memref<128x16xf32, #tpu.memory_space<vmem>>, vector<128x16xf32>
      %47 = vector.broadcast %45 : vector<128x1xf32> to vector<128x16xf32>
      %48 = arith.mulf %46, %47 : vector<128x16xf32>
      %49 = tpu.transpose %48, [1, 0] : vector<128x16xf32> -> vector<16x128xf32>
      %c0_33 = arith.constant 0 : index
      %c0_34 = arith.constant 0 : index
      %50 = memref.load %arg9[%c0_33, %c0_34] : memref<1x1xf32, #tpu.memory_space<smem>>
      %51 = vector.broadcast %50 : f32 to vector<16x128xf32>
      %52 = arith.mulf %51, %49 : vector<16x128xf32>
      %c0_35 = arith.constant 0 : index
      %c0_36 = arith.constant 0 : index
      %c0_37 = arith.constant 0 : index
      %53 = vector.load %arg3[%c0_35, %c0_36, %c0_37] : memref<1x16x128xf32, #tpu.memory_space<vmem>>, vector<1x16x128xf32>
      %54 = vector.shape_cast %53 : vector<1x16x128xf32> to vector<16x128xf32>
      %55 = arith.addf %52, %54 : vector<16x128xf32>
      %c0_38 = arith.constant 0 : index
      %c0_39 = arith.constant 0 : index
      %c0_40 = arith.constant 0 : index
      %56 = vector.load %arg10[%c0_38, %c0_39, %c0_40] : memref<1x16x128xf32, #tpu.memory_space<vmem>>, vector<1x16x128xf32>
      %57 = vector.shape_cast %56 : vector<1x16x128xf32> to vector<16x128xf32>
      %58 = vector.shape_cast %55 : vector<16x128xf32> to vector<1x16x128xf32>
      tpu.vector_store %arg10[%c0_38, %c0_39, %c0_40], %58 {strides = array<i32>} : memref<1x16x128xf32, #tpu.memory_space<vmem>>, vector<1x16x128xf32>,
    } else {
    }
    return
  }
  func.func @transform_0(%arg0: i32, %arg1: i32, %arg2: i32) -> (i32, i32, i32) {
    %c0_i32 = arith.constant 0 : i32
    %c0_i32_0 = arith.constant 0 : i32
    return %arg0, %c0_i32, %arg1 : i32, i32, i32
  }
  func.func @transform_1(%arg0: i32, %arg1: i32, %arg2: i32) -> (i32, i32, i32) {
    %c0_i32 = arith.constant 0 : i32
    %c0_i32_0 = arith.constant 0 : i32
    return %arg0, %c0_i32, %arg2 : i32, i32, i32
  }
  func.func @transform_2(%arg0: i32, %arg1: i32, %arg2: i32) -> (i32, i32) {
    %c0_i32 = arith.constant 0 : i32
    %c0_i32_0 = arith.constant 0 : i32
    %c0_i32_1 = arith.constant 0 : i32
    return %c0_i32, %c0_i32_0 : i32, i32
  }
  func.func @transform_3(%arg0: i32, %arg1: i32, %arg2: i32) -> (i32, i32) {
    %c0_i32 = arith.constant 0 : i32
    %c0_i32_0 = arith.constant 0 : i32
    %c0_i32_1 = arith.constant 0 : i32
    return %c0_i32, %c0_i32_0 : i32, i32
  }
  func.func @transform_4(%arg0: i32, %arg1: i32, %arg2: i32) -> (i32, i32) {
    %c0_i32 = arith.constant 0 : i32
    %c0_i32_0 = arith.constant 0 : i32
    %c0_i32_1 = arith.constant 0 : i32
    return %c0_i32, %c0_i32_0 : i32, i32
  }
  func.func @transform_5(%arg0: i32, %arg1: i32, %arg2: i32) -> (i32, i32) {
    %c0_i32 = arith.constant 0 : i32
    %c0_i32_0 = arith.constant 0 : i32
    %c0_i32_1 = arith.constant 0 : i32
    return %c0_i32, %c0_i32_0 : i32, i32
  }
  func.func @transform_6(%arg0: i32, %arg1: i32, %arg2: i32) -> (i32, i32) {
    %c0_i32 = arith.constant 0 : i32
    %c0_i32_0 = arith.constant 0 : i32
    %c0_i32_1 = arith.constant 0 : i32
    return %c0_i32, %c0_i32_0 : i32, i32
  }
  func.func @transform_7(%arg0: i32, %arg1: i32, %arg2: i32) -> (i32, i32, i32) {
    %c0_i32 = arith.constant 0 : i32
    %c0_i32_0 = arith.constant 0 : i32
    return %arg0, %c0_i32, %arg1 : i32, i32, i32
  }
}

</mosaic_0001>

<bundles_post_ra>
// kernel: tpu_custom_call.1
= control target key start
LH: loop header
LB: loop body
LE: loop exit
PB: predicated region body
PF: predicated region fallthrough
CT: control target
= control target key end

     0   :  { %s3313_s0 = inlined_call_operand.hbm [shape: f32[2,16,256], index: 0, kind: input, shape index: {}]   ;;  %s3314_s1 = inlined_call_operand.hbm [shape: f32[2,16,256], index: 1, kind: input, shape index: {}]   ;;  %s3315_s2 = inlined_call_operand.vmem [shape: bf16[16,16], index: 2, kind: input, shape index: {}]   ;;  %s3316_s3 = inlined_call_operand.vmem [shape: bf16[1,16], index: 3, kind: input, shape index: {}]   ;;  %s3317_s4 = inlined_call_operand.vmem [shape: bf16[16,16], index: 4, kind: input, shape index: {}]   ;;  %s3318_s5 = inlined_call_operand.vmem [shape: f32[16,1], index: 5, kind: input, shape index: {}]   ;;  %s3319_s6 = inlined_call_operand.<no memory space> [shape: f32[1,1], index: 6, kind: input, shape index: {}]   ;;  %s3320_s7 = inlined_call_operand.hbm [shape: f32[2,16,256], index: 7, kind: output, shape index: {}]  }
   0x1   :  { %3336 = sst [smem:[#allocation25_spill]] %s3313_s0 }
   0x2   :  { %3337 = sst [smem:[#allocation26_spill]] %s3318_s5 }
   0x3   :  { %3338 = sst [smem:[#allocation27_spill]] %s3320_s7 }
   0x4   :  { %12 = sst [smem:[#allocation6]] %s3319_s6 }
   0x5   :  { %13 = vsyncpa [#allocation8], 0 }
   0x6   :  { %15 = vsyncpa [#allocation8 + $0x1], 0 }
   0x7   :  { %16 = vsyncpa [#allocation11], 0 }
   0x8   :  { %18 = vsyncpa [#allocation11 + $0x1], 0 }
   0x9   :  { %19 = vsyncpa [#allocation9], 0 }
   0xa   :  { %21 = vsyncpa [#allocation9 + $0x1], 0  ;;  %s2572_s26 = smov 0   ;;  %s2574_s27 = smov 0  }
   0xb   :  { %s2576_s28 = smov 0   ;;  %s2578_s29 = smov 0  }
   0xc   :  { %s2580_s30 = smov 0   ;;  %s2582_s8 = smov 0  }
   0xd   :  { %s2584_s9 = smov 0   ;;  %s2586_s6 = smov 0  }
   0xe   :  { %s2588_s10 = smov 0   ;;  %s2590_s11 = smov 0  }
   0xf   :  { %s2592_s12 = smov 0   ;;  %s2594_s13 = smov 0  }
  0x10   :  { %s2596_s14 = smov 0  }
  0x11 LB: > { %3339 = sst [smem:[#allocation16_spill]] %s2476_s29  ;;  %s1891_s15 = sadd.s32 4294967295, %s2512_s14   ;;  %s2512_s14 = sphi %s2596_s14, %s27_s14   ;;  %s2508_s13 = sphi %s2594_s13, %s3390_s13   ;;  %s2504_s12 = sphi %s2592_s12, %s3381_s12   ;;  %s2500_s11 = sphi %s2590_s11, %s3380_s11   ;;  %s2496_s10 = sphi %s2588_s10, %s3389_s10   ;;  %s2492_s6 = sphi %s2586_s6, %s3379_s6   ;;  %s2488_s9 = sphi %s2584_s9, %s3378_s9   ;;  %s2484_s8 = sphi %s2582_s8, %s3388_s8   ;;  %s2480_s30 = sphi %s2580_s30, %s3387_s30   ;;  %s2476_s29 = sphi %s2578_s29, %s3386_s29   ;;  %s2472_s28 = sphi %s2576_s28, %s3385_s28   ;;  %s2468_s27 = sphi %s2574_s27, %s3384_s27   ;;  %s2464_s26 = sphi %s2572_s26, %s3383_s26  }
  0x12   : > { %3340 = sst [smem:[#allocation17_spill]] %s2492_s6  ;;  %s1892_s16 = sadd.s32 4294967294, %s2512_s14  }
  0x13   : > { %3341 = sst [smem:[#allocation18_spill]] %s2496_s10  ;;  %p62_p0 = scmp.ne.s32.totalorder %s2484_s8, %s2480_s30 }
  0x14   : > { %3342 = sst [smem:[#allocation19_spill]] %s2500_s11  ;;  %p3327_p1 = scmp.eq.s32.totalorder %s2512_s14, 0 }
  0x15   : > { %3343 = sst [smem:[#allocation20_spill]] %s2504_s12  ;;  %p68_p2 = scmp.ne.s32.totalorder %s2480_s30, %s2476_s29 }
  0x16   : > { %p2646_p3 = scmp.eq.s32.totalorder %s1891_s15, 0  ;;  %p227_p4 = scmp.eq.s32.totalorder %s1891_s15, 7 }
  0x17   : > { %p2652_p5 = por %p3327_p1, %p62_p0  ;;  %p233_p6 = scmp.eq.s32.totalorder %s1892_s16, 7 }
  0x18   : > { %p2658_p7 = por %p2646_p3, %p68_p2  ;;  %p2662_p8 = por %p227_p4, %p62_p0 }
  0x19   : > { %p2666_p9 = por %p233_p6, %p68_p2  ;;  %p2088_p10 = scmp.lt.s32.totalorder %s2512_s14, 8 }
  0x1a   : > { %s3347_s22 = scalar_select %p2662_p8, 1, 0 }
  0x1b   : > { %s3349_s23 = scalar_select %p2666_p9, 1, 0 }
  0x1c   : > { %3348 = sst [smem:[#allocation21_spill]] %s3347_s22  ;;  %s268_s24 = sand.u32 1, %s2484_s8  }
  0x1d   : > { %3350 = sst [smem:[#allocation22_spill]] %s3349_s23  ;;  %s1895_s25 = sshll.u32 %s268_s24, 4 }
  0x1e   : > { %s1896_s15 = sshll.u32 %s2508_s13, 2  ;;  %s272_s16 = scalar_lea.vmem [#allocation7], %s1895_s25 }
  0x1f   : > { %s277_s18 = sadd.s32 %s2504_s12, %s1896_s15  ;;  %s280_s17 = sshll.u32 %s272_s16, 4  ;;  %s281_s17 = int_to_ptr.vmem [resolvable:$true] %s280_s17 }
  0x20   : > { %s1897_s29 = sshll.u32 %s277_s18, 7  ;;  %s3351_s0 = sld [smem:[#allocation25_spill]] }
  0x21   : > { %p2683_p11 = pnand %p2088_p10, %p2652_p5  ;;  %s269_s23 = scalar_lea.sflag [#allocation8], %s268_s24 }
  0x22   : > { %s2329_s5 = scalar_lea.vmem %s281_s17, 256  ;;  %s2514_s18 = smov [#allocation7]  }
  0x23   : > { %p2318_p12 = pneg %p2683_p11  ;;  %p2330_p13 = scmp.ne.s32.totalorder %s281_s17, %s2329_s5 }
  0x24   : > { %s2334_s25 = sshll.u32 %s2514_s18, 4  ;;  %s2335_s25 = int_to_ptr.vmem [resolvable:$false] %s2334_s25 }
  0x25   : > { %p2332_p0 = pnand %p2330_p13, %p2318_p12  ;;  %s2336_s16 = scalar_lea.vmem %s2335_s25, 512 }
  0x26   : > { %s279_s10 = scalar_lea.hbm %s3351_s0, %s1897_s29  ;;  %p2337_p4 = scmp.lt.s32.totalorder %s281_s17, %s2335_s25 }
  0x27   : > { %p2333_p2 = pneg %p2332_p0  ;;  %p2338_p6 = scmp.lt.s32.totalorder %s2336_s16, %s2329_s5 }
  0x29   : > { %p2339_p1 = por %p2338_p6, %p2337_p4 }
  0x2b   : > { %p2340_p9 = pnand %p2339_p1, %p2333_p2 }
  0x2d   : > { %2343 = shalt.err (!%p2340_p9)
}
  0x2e   : > { %s3328_s7 = smov 256   ;;  %s3329_s29 = smov 128  }
  0x2f   : > { %s3330_s5 = smov 8   ;;  %p1901_p1 = scmp.ge.s32.totalorder %s2512_s14, 1 }
  0x30   : > { %2080 = dma.hbm_to_vmem [thread:$0]  (!%p2683_p11), %s279_s10, 256, %s281_s17, %s269_s23, %s3328_s7, %s3329_s29, %s3330_s5  }
  0x31   : > { %p310_p5 = scmp.lt.s32.totalorder %s2512_s14, 9  ;;  %s39_s24 = sadd.s32 1, %s2500_s11 }
  0x32   : > { %p40_p12 = scmp.ge.s32.totalorder %s39_s24, 2  ;;  %p96_p13 = scmp.ne.s32.totalorder %s2468_s27, %s2464_s26 }
  0x33   : > { %p2697_p9 = pnand %p1901_p1, %p310_p5  ;;  %s3355_s10 = sadd.s32 1, %s2504_s12 }
  0x34   : > { %s3392_s24 = smov (%p40_p12, %s39_s24), 0  ;;  %s3394_s10 = smov (!%p40_p12, %s3355_s10), %s2504_s12 }
  0x35   : > { %3354 = sst [smem:[#allocation23_spill]] %s3392_s24  ;;  %s79_s17 = ssub.s32 %s2500_s11, %s3392_s24 }
  0x36   : > { %p90_p11 = scmp.ne.s32.totalorder %s2472_s28, %s2468_s27  ;;  %p44_p0 = scmp.ge.s32.totalorder %s3394_s10, 2 }
  0x37   : > { %p2716_p2 = por %p96_p13, %p2646_p3  ;;  %s290_s18 = sand.u32 1, %s2472_s28  }
  0x38   : > { %s299_s25 = sadd.s32 %s2500_s11, %s1896_s15  ;;  %s3396_s10 = smov (%p44_p0, %s3394_s10), 0 }
  0x39   : > { %3357 = sst [smem:[#allocation24_spill]] %s3396_s10  ;;  %s3358_s26 = sadd.s32 1, %s2508_s13 }
  0x3a   : > { %s3398_s26 = smov (!%p44_p0, %s3358_s26), %s2508_s13  ;;  %s51_s16 = ssub.s32 %s2504_s12, %s3396_s10 }
  0x3b   : > { %p3359_p4 = scmp.eq.s32.totalorder %s2512_s14, 0  ;;  %p48_p3 = scmp.ge.s32.totalorder %s3398_s26, 2 }
  0x3c   : > { %s1898_s19 = sshll.u32 %s290_s18, 4  ;;  %s1900_s15 = sshll.u32 %s299_s25, 7 }
  0x3d   : > { %p2733_p6 = por %p90_p11, %p3359_p4  ;;  %s3400_s26 = smov (%p48_p3, %s3398_s26), 0 }
  0x3e   : > { %s2742_s22 = scalar_lea.hbm %s3314_s1, %s1900_s15  ;;  %s50_s6 = ssub.s32 %s2508_s13, %s3400_s26 }
  0x3f   : > { %s294_s0 = scalar_lea.vmem [#allocation10], %s1898_s19  ;;  %s52_s24 = sor.u32 %s51_s16, %s50_s6 }
  0x40   : > { %s302_s10 = sshll.u32 %s294_s0, 4  ;;  %s80_s12 = sor.u32 %s79_s17, %s50_s6  ;;  %s303_s10 = int_to_ptr.vmem [resolvable:$true] %s302_s10 }
  0x41   : > { %p53_p1 = scmp.eq.s32.totalorder %s52_s24, 0  ;;  %p81_p5 = scmp.eq.s32.totalorder %s80_s12, 0 }
  0x42   : > { %p2750_p12 = pnand %p2088_p10, %p2733_p6  ;;  %s3362_s11 = sadd.s32 1, %s2484_s8 }
  0x43   : > { %s2757_s29 = scalar_select %p53_p1, %s2484_s8, %s3362_s11  }
  0x44   : > { %s3363_s5 = sadd.s32 1, %s2472_s28  ;;  %s291_s19 = scalar_lea.sflag [#allocation11], %s290_s18 }
  0x45   : > { %s2762_s15 = scalar_select %p81_p5, %s2472_s28, %s3363_s5  }
  0x46   : > { %p2346_p13 = pneg %p2750_p12  ;;  %s2357_s0 = scalar_lea.vmem %s303_s10, 256 }
  0x47   : > { %p2358_p11 = scmp.ne.s32.totalorder %s303_s10, %s2357_s0  ;;  %s2518_s12 = smov [#allocation10]  }
  0x48   : > { %s2362_s7 = sshll.u32 %s2518_s12, 4  ;;  %s2363_s7 = int_to_ptr.vmem [resolvable:$false] %s2362_s7 }
  0x49   : > { %p2360_p0 = pnand %p2358_p11, %p2346_p13  ;;  %s2364_s6 = scalar_lea.vmem %s2363_s7, 512 }
  0x4a   : > { %p2365_p10 = scmp.lt.s32.totalorder %s303_s10, %s2363_s7  ;;  %p2366_p6 = scmp.lt.s32.totalorder %s2364_s6, %s2357_s0 }
  0x4b   : > { %p2361_p4 = pneg %p2360_p0 }
  0x4c   : > { %p2367_p3 = por %p2366_p6, %p2365_p10 }
  0x4e   : > { %p2368_p8 = pnand %p2367_p3, %p2361_p4 }
  0x50   : > { %2371 = shalt.err (!%p2368_p8)
}
  0x51   : > { %s3364_s11 = smov 8   ;;  %s3365_s24 = smov 128  }
  0x52   : > { %s3366_s17 = smov 256   ;;  %314 = sbr.rel (%p2697_p9) target bundleno = 1536 (0x600), region = 48 }
  0x53   : > { %2083 = dma.hbm_to_vmem [thread:$0]  (!%p2750_p12), %s2742_s22, 256, %s303_s10, %s291_s19, %s3366_s17, %s3365_s24, %s3364_s11  }
  0x54   : > { %s2775_s18 = sand.u32 (!%p2697_p9), 1, %s2480_s30  }
  0x55   : > { %s1902_s16 = sshll.u32 (!%p2697_p9), %s2775_s18, 4  ;;  %s317_s5 = scalar_lea.sflag (!%p2697_p9), [#allocation8], %s2775_s18 }
  0x56   : > { %s2779_s0 = scalar_lea.vmem (!%p2697_p9), [#allocation7], %s1902_s16 }
  0x57   : > { %2451 = dma.done.wait (%p2658_p7), %s317_s5, 256  }
  0x58   : > { %2453 = vsyncadd (%p2658_p7), %s317_s5, 4294967040  ;;  %s325_s22 = sand.u32 1, %s2468_s27  }
  0x59   : > { %s2786_s20 = sshll.u32 %s325_s22, 4  ;;  %s326_s10 = scalar_lea.sflag [#allocation11], %s325_s22 }
  0x5a   : > { %s329_s25 = scalar_lea.vmem [#allocation10], %s2786_s20 }
  0x5b   : > { %2455 = dma.done.wait (%p2716_p2), %s326_s10, 256  }
  0x5c   : > { %2457 = vsyncadd (%p2716_p2), %s326_s10, 4294967040  ;;  %s2793_s19 = scalar_lea.vmem [#allocation12], %s1902_s16  ;;  %p1905_p8 = scmp.ne.s32.totalorder %s2488_s9, 0 }
  0x5e   : > { %369 = sbr.rel (%p1905_p8) target bundleno = 489 (0x1e9), region = 60 }
  0x63   : > { %v370_v0 = vld [vmem:[%s2779_s0] sm:$0xff]  ;;  %v371_v1 = vld [vmem:[%s2779_s0 + $0x8] sm:$0xff]  ;;  %vm420_vm0 = vcmask 130048   ;;  %v2519_v2 = vmov 0.0   ;;  %vm623_vm1 = vcmask 7168   ;;  %v2520_v3 = vmov -inf  }
  0x64   : > { %372 = vxpose.xlu0.b32.start [1/2] (short) %v370_v0, 128  ;;  %656 = vst.msk [vmem:[#allocation5] sm:$0xff] %vm420_vm0, %v2519_v2  ;;  %657 = vst.msk [vmem:[#allocation5 + $0x8] sm:$0xff] %vm420_vm0, %v2519_v2  ;;  %v2206_v4 = vld [vmem:[%s3315_s2] sm:$0xff]   ;;  %vm606_vm2 = vcmask 125952  }
  0x65   : > { %658 = vst.msk [vmem:[#allocation5 + $0x10] sm:$0xff] %vm420_vm0, %v2519_v2  ;;  %659 = vst.msk [vmem:[#allocation5 + $0x18] sm:$0xff] %vm420_vm0, %v2519_v2  ;;  %2003 = vmatprep.subr.bf16.mxu0 %v2206_v4  ;;  %2069 = vmatprep.subr.bf16.mxu1 %v2206_v4 }
  0x66   : > { %660 = vst.msk [vmem:[#allocation5 + $0x20] sm:$0xff] %vm420_vm0, %v2519_v2  ;;  %661 = vst.msk [vmem:[#allocation5 + $0x28] sm:$0xff] %vm420_vm0, %v2519_v2  ;;  %2004 = vmatpush3.bf16.msra.mxu0 %v2206_v4  ;;  %2070 = vmatpush3.bf16.msra.mxu1 %v2206_v4 }
  0x67   : > { %662 = vst.msk [vmem:[#allocation5 + $0x30] sm:$0xff] %vm420_vm0, %v2519_v2  ;;  %663 = vst.msk [vmem:[#allocation5 + $0x38] sm:$0xff] %vm420_vm0, %v2519_v2 }
  0x68   : > { %664 = vst.msk [vmem:[#allocation5 + $0x40] sm:$0xff] %vm420_vm0, %v2519_v2  ;;  %665 = vst.msk [vmem:[#allocation5 + $0x48] sm:$0xff] %vm420_vm0, %v2519_v2  ;;  %373 = vxpose.xlu0.b32.end [2/2] (short) %v371_v1, 128 }
  0x69   : > { %666 = vst.msk [vmem:[#allocation5 + $0x50] sm:$0xff] %vm420_vm0, %v2519_v2  ;;  %667 = vst.msk [vmem:[#allocation5 + $0x58] sm:$0xff] %vm420_vm0, %v2519_v2 }
  0x6a   : > { %668 = vst.msk [vmem:[#allocation5 + $0x60] sm:$0xff] %vm420_vm0, %v2519_v2  ;;  %669 = vst.msk [vmem:[#allocation5 + $0x68] sm:$0xff] %vm420_vm0, %v2519_v2 }
  0x6b   : > { %670 = vst.msk [vmem:[#allocation5 + $0x70] sm:$0xff] %vm420_vm0, %v2519_v2  ;;  %671 = vst.msk [vmem:[#allocation5 + $0x78] sm:$0xff] %vm420_vm0, %v2519_v2 }
  0x6c   : > { %624 = vst.msk [vmem:[#allocation3] sm:$0xff] %vm623_vm1, %v2520_v3  ;;  %625 = vst.msk [vmem:[#allocation3 + $0x8] sm:$0xff] %vm623_vm1, %v2520_v3 }
  0x6d   : > { %626 = vst.msk [vmem:[#allocation3 + $0x10] sm:$0xff] %vm623_vm1, %v2520_v3  ;;  %627 = vst.msk [vmem:[#allocation3 + $0x18] sm:$0xff] %vm623_vm1, %v2520_v3 }
  0x6e   : > { %628 = vst.msk [vmem:[#allocation3 + $0x20] sm:$0xff] %vm623_vm1, %v2520_v3  ;;  %629 = vst.msk [vmem:[#allocation3 + $0x28] sm:$0xff] %vm623_vm1, %v2520_v3 }
  0x6f   : > { %630 = vst.msk [vmem:[#allocation3 + $0x30] sm:$0xff] %vm623_vm1, %v2520_v3  ;;  %631 = vst.msk [vmem:[#allocation3 + $0x38] sm:$0xff] %vm623_vm1, %v2520_v3 }
  0x70   : > { %632 = vst.msk [vmem:[#allocation3 + $0x40] sm:$0xff] %vm623_vm1, %v2520_v3  ;;  %633 = vst.msk [vmem:[#allocation3 + $0x48] sm:$0xff] %vm623_vm1, %v2520_v3 }
  0x71   : > { %634 = vst.msk [vmem:[#allocation3 + $0x50] sm:$0xff] %vm623_vm1, %v2520_v3  ;;  %635 = vst.msk [vmem:[#allocation3 + $0x58] sm:$0xff] %vm623_vm1, %v2520_v3 }
  0x72   : > { %636 = vst.msk [vmem:[#allocation3 + $0x60] sm:$0xff] %vm623_vm1, %v2520_v3  ;;  %637 = vst.msk [vmem:[#allocation3 + $0x68] sm:$0xff] %vm623_vm1, %v2520_v3 }
  0x73   : > { %638 = vst.msk [vmem:[#allocation3 + $0x70] sm:$0xff] %vm623_vm1, %v2520_v3  ;;  %639 = vst.msk [vmem:[#allocation3 + $0x78] sm:$0xff] %vm623_vm1, %v2520_v3 }
  0x74   : > { %640 = vst.msk [vmem:[#allocation4] sm:$0xff] %vm623_vm1, %v2519_v2  ;;  %641 = vst.msk [vmem:[#allocation4 + $0x8] sm:$0xff] %vm623_vm1, %v2519_v2 }
  0x75   : > { %642 = vst.msk [vmem:[#allocation4 + $0x10] sm:$0xff] %vm623_vm1, %v2519_v2  ;;  %643 = vst.msk [vmem:[#allocation4 + $0x18] sm:$0xff] %vm623_vm1, %v2519_v2 }
  0x76   : > { %644 = vst.msk [vmem:[#allocation4 + $0x20] sm:$0xff] %vm623_vm1, %v2519_v2  ;;  %645 = vst.msk [vmem:[#allocation4 + $0x28] sm:$0xff] %vm623_vm1, %v2519_v2 }
  0x77   : > { %646 = vst.msk [vmem:[#allocation4 + $0x30] sm:$0xff] %vm623_vm1, %v2519_v2  ;;  %647 = vst.msk [vmem:[#allocation4 + $0x38] sm:$0xff] %vm623_vm1, %v2519_v2 }
  0x78   : > { %648 = vst.msk [vmem:[#allocation4 + $0x40] sm:$0xff] %vm623_vm1, %v2519_v2  ;;  %649 = vst.msk [vmem:[#allocation4 + $0x48] sm:$0xff] %vm623_vm1, %v2519_v2 }
  0x79   : > { %650 = vst.msk [vmem:[#allocation4 + $0x50] sm:$0xff] %vm623_vm1, %v2519_v2  ;;  %651 = vst.msk [vmem:[#allocation4 + $0x58] sm:$0xff] %vm623_vm1, %v2519_v2 }
  0x7a   : > { %652 = vst.msk [vmem:[#allocation4 + $0x60] sm:$0xff] %vm623_vm1, %v2519_v2  ;;  %653 = vst.msk [vmem:[#allocation4 + $0x68] sm:$0xff] %vm623_vm1, %v2519_v2 }
  0x7b   : > { %654 = vst.msk [vmem:[#allocation4 + $0x70] sm:$0xff] %vm623_vm1, %v2519_v2  ;;  %655 = vst.msk [vmem:[#allocation4 + $0x78] sm:$0xff] %vm623_vm1, %v2519_v2 }
  0xe0   : > { %v388_v5 = vpop.trf.xlu0 }
  0xe4   : > { %v389_v6 = vpop.trf.xlu0 }
  0xe5   : > { %v404_v7 = vpack.c.bf16 %v389_v6, %v388_v5 }
  0xe7   : > { %2005 = vmatprep.mubr.msk.bf16.mxu0 %vm420_vm0, %v404_v7 }
  0xe8   : > { %v390_v8 = vpop.trf.xlu0 }
  0xec   : > { %v391_v9 = vpop.trf.xlu0 }
  0xed   : > { %v405_v10 = vpack.c.bf16 %v391_v9, %v390_v8 }
  0xef   : > { %2006 = vmatmul.mubr.msk.bf16.vlgmr.msra.gmra.mxu0 %vm420_vm0, %v405_v10 }
  0xf0   : > { %v392_v11 = vpop.trf.xlu0 }
  0xf4   : > { %v393_v12 = vpop.trf.xlu0 }
  0xf5   : > { %v406_v13 = vpack.c.bf16 %v393_v12, %v392_v11 }
  0xf7   : > { %2009 = vmatprep.mubr.msk.bf16.mxu0 %vm420_vm0, %v406_v13 }
  0xf8   : > { %v394_v14 = vpop.trf.xlu0 }
  0xfc   : > { %v395_v15 = vpop.trf.xlu0 }
  0xfd   : > { %v407_v16 = vpack.c.bf16 %v395_v15, %v394_v14 }
  0xff   : > { %2010 = vmatmul.mubr.msk.bf16.gmra.mxu0 %vm420_vm0, %v407_v16 }
 0x100   : > { %v396_v17 = vpop.trf.xlu0 }
 0x104   : > { %v397_v18 = vpop.trf.xlu0 }
 0x105   : > { %v408_v19 = vpack.c.bf16 %v397_v18, %v396_v17 }
 0x107   : > { %2013 = vmatprep.mubr.msk.bf16.mxu1 %vm420_vm0, %v408_v19 }
 0x108   : > { %v398_v20 = vpop.trf.xlu0 }
 0x10c   : > { %v399_v21 = vpop.trf.xlu0 }
 0x10d   : > { %v409_v22 = vpack.c.bf16 %v399_v21, %v398_v20 }
 0x10f   : > { %2014 = vmatmul.mubr.msk.bf16.vlgmr.msra.gmra.mxu1 %vm420_vm0, %v409_v22 }
 0x110   : > { %v400_v23 = vpop.trf.xlu0 }
 0x114   : > { %v401_v24 = vpop.trf.xlu0 }
 0x115   : > { %v410_v25 = vpack.c.bf16 %v401_v24, %v400_v23 }
 0x117   : > { %2017 = vmatprep.mubr.msk.bf16.mxu1 %vm420_vm0, %v410_v25 }
 0x118   : > { %v402_v26 = vpop.trf.xlu0 }
 0x11c   : > { %v403_v27 = vpop.trf.xlu0 }
 0x11d   : > { %v411_v28 = vpack.c.bf16 %v403_v27, %v402_v26 }
 0x11f   : > { %2018 = vmatmul.mubr.msk.bf16.gmra.mxu1 %vm420_vm0, %v411_v28 }
 0x1af   : > { %v2007_v29 = vpop.f32.mrf.mxu0 }
 0x1b0   : > { %v1958_v30 = vpack.c.bf16 %v2007_v29, %v2007_v29 }
 0x1b1   : > { %v479_v31 = vpop.f32.mrf.mxu0 }
 0x1b2   : > { %609 = vst.msk [vmem:[#allocation2 + $0x8] sm:$0xf] %vm606_vm2, %v1958_v30  ;;  %v1956_v32 = vpack.c.bf16 %v479_v31, %v479_v31 }
 0x1b3   : > { %v2008_v33 = vpop.f32.mrf.mxu0 }
 0x1b4   : > { %607 = vst.msk [vmem:[#allocation2] sm:$0xf] %vm606_vm2, %v1956_v32  ;;  %v1959_v34 = vpack.c.bf16 %v2008_v33, %v2008_v33 }
 0x1b5   : > { %v482_v35 = vpop.f32.mrf.mxu0 }
 0x1b6   : > { %610 = vst.msk [vmem:[#allocation2 + $0xc] sm:$0xf] %vm606_vm2, %v1959_v34  ;;  %v1957_v36 = vpack.c.bf16 %v482_v35, %v482_v35 }
 0x1b8   : > { %608 = vst.msk [vmem:[#allocation2 + $0x4] sm:$0xf] %vm606_vm2, %v1957_v36 }
 0x1bf   : > { %v2011_v37 = vpop.f32.mrf.mxu0 }
 0x1c0   : > { %v1962_v38 = vpack.c.bf16 %v2011_v37, %v2011_v37 }
 0x1c1   : > { %v495_v39 = vpop.f32.mrf.mxu0 }
 0x1c2   : > { %613 = vst.msk [vmem:[#allocation2 + $0x18] sm:$0xf] %vm606_vm2, %v1962_v38  ;;  %v1960_v40 = vpack.c.bf16 %v495_v39, %v495_v39 }
 0x1c3   : > { %v2012_v41 = vpop.f32.mrf.mxu0 }
 0x1c4   : > { %611 = vst.msk [vmem:[#allocation2 + $0x10] sm:$0xf] %vm606_vm2, %v1960_v40  ;;  %v1963_v42 = vpack.c.bf16 %v2012_v41, %v2012_v41 }
 0x1c5   : > { %v498_v43 = vpop.f32.mrf.mxu0 }
 0x1c6   : > { %614 = vst.msk [vmem:[#allocation2 + $0x1c] sm:$0xf] %vm606_vm2, %v1963_v42  ;;  %v1961_v44 = vpack.c.bf16 %v498_v43, %v498_v43 }
 0x1c8   : > { %612 = vst.msk [vmem:[#allocation2 + $0x14] sm:$0xf] %vm606_vm2, %v1961_v44 }
 0x1cf   : > { %v2015_v45 = vpop.f32.mrf.mxu1 }
 0x1d0   : > { %v1966_v46 = vpack.c.bf16 %v2015_v45, %v2015_v45 }
 0x1d1   : > { %v511_v47 = vpop.f32.mrf.mxu1 }
 0x1d2   : > { %617 = vst.msk [vmem:[#allocation2 + $0x28] sm:$0xf] %vm606_vm2, %v1966_v46  ;;  %v1964_v48 = vpack.c.bf16 %v511_v47, %v511_v47 }
 0x1d3   : > { %v2016_v49 = vpop.f32.mrf.mxu1 }
 0x1d4   : > { %615 = vst.msk [vmem:[#allocation2 + $0x20] sm:$0xf] %vm606_vm2, %v1964_v48  ;;  %v1967_v50 = vpack.c.bf16 %v2016_v49, %v2016_v49 }
 0x1d5   : > { %v514_v51 = vpop.f32.mrf.mxu1 }
 0x1d6   : > { %618 = vst.msk [vmem:[#allocation2 + $0x2c] sm:$0xf] %vm606_vm2, %v1967_v50  ;;  %v1965_v52 = vpack.c.bf16 %v514_v51, %v514_v51 }
 0x1d8   : > { %616 = vst.msk [vmem:[#allocation2 + $0x24] sm:$0xf] %vm606_vm2, %v1965_v52 }
 0x1df   : > { %v2019_v53 = vpop.f32.mrf.mxu1 }
 0x1e0   : > { %v1970_v54 = vpack.c.bf16 %v2019_v53, %v2019_v53 }
 0x1e1   : > { %v527_v55 = vpop.f32.mrf.mxu1 }
 0x1e2   : > { %621 = vst.msk [vmem:[#allocation2 + $0x38] sm:$0xf] %vm606_vm2, %v1970_v54  ;;  %v1968_v56 = vpack.c.bf16 %v527_v55, %v527_v55 }
 0x1e3   : > { %v2020_v57 = vpop.f32.mrf.mxu1 }
 0x1e4   : > { %619 = vst.msk [vmem:[#allocation2 + $0x30] sm:$0xf] %vm606_vm2, %v1968_v56  ;;  %v1971_v58 = vpack.c.bf16 %v2020_v57, %v2020_v57 }
 0x1e5   : > { %v530_v59 = vpop.f32.mrf.mxu1 }
 0x1e6   : > { %622 = vst.msk [vmem:[#allocation2 + $0x3c] sm:$0xf] %vm606_vm2, %v1971_v58  ;;  %v1969_v60 = vpack.c.bf16 %v530_v59, %v530_v59 }
 0x1e8   : > { %620 = vst.msk [vmem:[#allocation2 + $0x34] sm:$0xf] %vm606_vm2, %v1969_v60 }
 0x1e9 PF: > { %v672_v61 = vld [vmem:[%s329_s25] sm:$0xff]  ;;  %v673_v62 = vld [vmem:[%s329_s25 + $0x8] sm:$0xff]  ;;  %v2521_v63 = vmov 0.0   ;;  %vm2522_vm3 = vmmov 0   ;;  %vm692_vm4 = vcmask 130048   ;;  %v736_v11 = vlaneseq  ;;  %s3367_s16 = sld [smem:[#allocation26_spill]] }
 0x1ea   : > { %2021 = vmatprep.subr.bf16.mxu1 %v2521_v63  ;;  %v674_v0 = vpack.c.bf16 %v673_v62, %v672_v61  ;;  %2023 = vmatprep.mubr.msk.bf16.mxu1 %vm2522_vm3, %v2521_v63  ;;  %v691_v1 = vld [vmem:[%s3316_s3] sm:$0x1]  ;;  %v2210_v3 = vld [vmem:[#allocation2 + $0x8] sm:$0xff]   ;;  %v2211_v4 = vld [vmem:[#allocation2 + $0x10] sm:$0xff]   ;;  %v2523_v33 = vmov 0   ;;  %vm1221_vm5 = vcmask 7168  }
 0x1eb   : > { %2045 = vmatprep.subr.bf16.mxu0 %v2521_v63  ;;  %2047 = vmatprep.mubr.msk.bf16.mxu0 %vm2522_vm3, %v2521_v63  ;;  %v2209_v2 = vld [vmem:[#allocation2] sm:$0xff]   ;;  %v2212_v5 = vld [vmem:[#allocation2 + $0x18] sm:$0xff]   ;;  %v2214_v7 = vld [vmem:[#allocation2 + $0x28] sm:$0xff]   ;;  %v737_v12 = vshrl.u32 %v736_v11, 7  ;;  %p1950_p7 = scmp.ne.s32.totalorder %s2488_s9, 1 }
 0x1ec   : > { %2022 = vmatpush3.bf16.msra.mxu1 %v674_v0  ;;  %2046 = vmatpush3.bf16.msra.mxu0 %v674_v0  ;;  %v2213_v6 = vld [vmem:[#allocation2 + $0x20] sm:$0xff]   ;;  %v2941_v52 = vld [vmem:[#allocation3 + $0x10] sm:$0xff]  ;;  %v2946_v57 = vld [vmem:[#allocation3 + $0x18] sm:$0xff]  ;;  %s1747_s9 = sld [smem:[#allocation6]] (!%p1950_p7) }
 0x1ed   : > { %2027 = vmatprep.subr.bf16.mxu1 %v674_v0  ;;  %v2216_v9 = vld [vmem:[#allocation2 + $0x38] sm:$0xff]   ;;  %v2217_v10 = vld [vmem:[%s3317_s4] sm:$0xff]   ;;  %v738_v15 = vsub.s32 0, %v737_v12  ;;  %2208 = vset.pattern.permute.xlu1 %v2523_v33  ;;  %v2951_v60 = vld [vmem:[#allocation3 + $0x8] sm:$0xff] }
 0x1ee   : > { %2207 = vset.pattern.permute.xlu0 %v2523_v33  ;;  %v901_v54 = vld [vmem:[#allocation3] sm:$0xff] }
 0x1ef   : > { %2024 = vmatmul.mubr.msk.bf16.vlgmr.msra.gmra.mxu1 %vm692_vm4, %v691_v1  ;;  %v2215_v8 = vld [vmem:[#allocation2 + $0x30] sm:$0xff]   ;;  %2048 = vmatmul.mubr.msk.bf16.vlgmr.msra.gmra.mxu0 %vm692_vm4, %v2217_v10  ;;  %v1257_v63 = vld [vmem:[%s3367_s16 + $0x8] sm:$0xff]  ;;  %v2962_v1 = vld [vmem:[#allocation3 + $0x20] sm:$0xff] }
 0x1f0   : > { %2028 = vmatpush3.bf16.msra.mxu1 %v674_v0  ;;  %2029 = vmatprep.mubr.msk.bf16.mxu1 %vm692_vm4, %v2209_v2 }
 0x1f7   : > { %2030 = vmatmul.mubr.msk.bf16.vlgmr.msra.gmra.mxu1 %vm692_vm4, %v2210_v3  ;;  %v2966_v3 = vld [vmem:[#allocation3 + $0x38] sm:$0xff] }
 0x1f8   : > { %2033 = vmatprep.mubr.msk.bf16.mxu1 %vm692_vm4, %v2211_v4 }
 0x1ff   : > { %2034 = vmatmul.mubr.msk.bf16.gmra.mxu1 %vm692_vm4, %v2212_v5 }
 0x200   : > { %2037 = vmatprep.mubr.msk.bf16.mxu1 %vm692_vm4, %v2213_v6  ;;  %v2972_v6 = vld [vmem:[#allocation3 + $0x30] sm:$0xff] }
 0x207   : > { %2038 = vmatmul.mubr.msk.bf16.gmra.mxu1 %vm692_vm4, %v2214_v7 }
 0x208   : > { %2041 = vmatprep.mubr.msk.bf16.mxu1 %vm692_vm4, %v2215_v8 }
 0x20f   : > { %2042 = vmatmul.mubr.msk.bf16.gmra.mxu1 %vm692_vm4, %v2216_v9  ;;  %v2977_v9 = vld [vmem:[#allocation3 + $0x28] sm:$0xff] }
 0x2af   : > { %v730_v13 = vpop.f32.mrf.mxu1  ;;  %v2983_v11 = vpop.f32.mrf.mxu0 }
 0x2b0   : > { %v739_v18 = vrot.slane %v730_v13, %v738_v15  ;;  %v2985_v13 = vld [vmem:[#allocation3 + $0x40] sm:$0xff] }
 0x2b1   : > { %v2025_v14 = vpop.f32.mrf.mxu1  ;;  %v2049_v15 = vpop.f32.mrf.mxu0 }
 0x2b3   : > { %v733_v16 = vpop.f32.mrf.mxu1 }
 0x2b5   : > { %v2026_v17 = vpop.f32.mrf.mxu1 }
 0x2b6   : > { %v2991_v17 = vld [vmem:[#allocation3 + $0x58] sm:$0xff] }
 0x2b7   : > { %v2031_v19 = vpop.f32.mrf.mxu1 }
 0x2b8   : > { %v2893_v20 = vadd.f32 %v2031_v19, %v739_v18  ;;  %v2997_v19 = vpop.f32.mrf.mxu0 }
 0x2b9   : > { %v838_v21 = vpop.f32.mrf.mxu1 }
 0x2ba   : > { %v2895_v22 = vadd.f32 %v838_v21, %v739_v18  ;;  %921 = vmax.xlane.f32.xlu1 %v2893_v20 }
 0x2bb   : > { %v2032_v23 = vpop.f32.mrf.mxu1 }
 0x2bc   : > { %v2898_v24 = vadd.f32 %v2032_v23, %v739_v18  ;;  %917 = vmax.xlane.f32.xlu0 %v2895_v22  ;;  %v2999_v23 = vld [vmem:[#allocation3 + $0x50] sm:$0xff] }
 0x2bd   : > { %v841_v25 = vpop.f32.mrf.mxu1 }
 0x2be   : > { %v2901_v26 = vadd.f32 %v841_v25, %v739_v18  ;;  %923 = vmax.xlane.f32.xlu1 %v2898_v24 }
 0x2bf   : > { %v2035_v27 = vpop.f32.mrf.mxu1 }
 0x2c0   : > { %919 = vmax.xlane.f32.xlu0 %v2901_v26  ;;  %v2910_v34 = vadd.f32 %v2035_v27, %v739_v18 }
 0x2c1   : > { %v854_v28 = vpop.f32.mrf.mxu1 }
 0x2c2   : > { %v2905_v29 = vadd.f32 %v854_v28, %v739_v18  ;;  %v2050_v28 = vpop.f32.mrf.mxu0 }
 0x2c3   : > { %v2036_v30 = vpop.f32.mrf.mxu1 }
 0x2c4   : > { %v2907_v31 = vadd.f32 %v2036_v30, %v739_v18  ;;  %925 = vmax.xlane.f32.xlu0 %v2905_v29 }
 0x2c5   : > { %v857_v32 = vpop.f32.mrf.mxu1 }
 0x2c6   : > { %931 = vmax.xlane.f32.xlu1 %v2907_v31  ;;  %v2913_v36 = vadd.f32 %v857_v32, %v739_v18  ;;  %v910_v32 = vld [vmem:[#allocation3 + $0x48] sm:$0xff] }
 0x2c7   : > { %v2039_v35 = vpop.f32.mrf.mxu1 }
 0x2c8   : > { %929 = vmax.xlane.f32.xlu0 %v2910_v34  ;;  %v2922_v42 = vadd.f32 %v2039_v35, %v739_v18 }
 0x2c9   : > { %v870_v37 = vpop.f32.mrf.mxu1 }
 0x2ca   : > { %v2916_v38 = vadd.f32 %v870_v37, %v739_v18  ;;  %927 = vmax.xlane.f32.xlu1 %v2913_v36 }
 0x2cb   : > { %v2040_v39 = vpop.f32.mrf.mxu1 }
 0x2cc   : > { %v2919_v40 = vadd.f32 %v2040_v39, %v739_v18  ;;  %933 = vmax.xlane.f32.xlu0 %v2916_v38  ;;  %v3010_v39 = vld [vmem:[#allocation3 + $0x60] sm:$0xff] }
 0x2cd   : > { %v873_v41 = vpop.f32.mrf.mxu1 }
 0x2ce   : > { %939 = vmax.xlane.f32.xlu1 %v2919_v40  ;;  %v2925_v44 = vadd.f32 %v873_v41, %v739_v18 }
 0x2cf   : > { %v2043_v43 = vpop.f32.mrf.mxu1 }
 0x2d0   : > { %937 = vmax.xlane.f32.xlu0 %v2922_v42  ;;  %v2934_v50 = vadd.f32 %v2043_v43, %v739_v18 }
 0x2d1   : > { %v886_v45 = vpop.f32.mrf.mxu1 }
 0x2d2   : > { %v2928_v46 = vadd.f32 %v886_v45, %v739_v18  ;;  %935 = vmax.xlane.f32.xlu1 %v2925_v44 }
 0x2d3   : > { %v2044_v47 = vpop.f32.mrf.mxu1 }
 0x2d4   : > { %v2931_v48 = vadd.f32 %v2044_v47, %v739_v18  ;;  %941 = vmax.xlane.f32.xlu0 %v2928_v46  ;;  %v3014_v47 = vld [vmem:[#allocation3 + $0x78] sm:$0xff] }
 0x2d5   : > { %v889_v49 = vpop.f32.mrf.mxu1 }
 0x2d6   : > { %947 = vmax.xlane.f32.xlu1 %v2931_v48  ;;  %v2937_v51 = vadd.f32 %v889_v49, %v739_v18 }
 0x2d8   : > { %945 = vmax.xlane.f32.xlu0 %v2934_v50 }
 0x2da   : > { %943 = vmax.xlane.f32.xlu1 %v2937_v51 }
 0x343   : > { %v922_v53 = vpop.xlane.xlu1 %921 }
 0x344   : > { %v2944_v55 = vmax.f32 %v2941_v52, %v922_v53 }
 0x345   : > { %v918_v56 = vpop.xlane.xlu0 %917 }
 0x346   : > { %1240 = vst.msk [vmem:[#allocation3 + $0x10] sm:$0xff] %vm1221_vm5, %v2944_v55  ;;  %v949_v58 = vmax.f32 %v901_v54, %v918_v56  ;;  %1025 = vperm.xlu1 %2208, %v2944_v55   ;;  %v3020_v56 = vld [vmem:[#allocation3 + $0x70] sm:$0xff] }
 0x347   : > { %v924_v59 = vpop.xlane.xlu1 %923 }
 0x348   : > { %1238 = vst.msk [vmem:[#allocation3] sm:$0xff] %vm1221_vm5, %v949_v58  ;;  %v952_v61 = vmax.f32 %v2946_v57, %v924_v59  ;;  %1015 = vperm.xlu0 %2207, %v949_v58   ;;  %v965_v25 = vsub.f32 %v901_v54, %v949_v58 }
 0x349   : > { %v920_v62 = vpop.xlane.xlu0 %919 }
 0x34a   : > { %1241 = vst.msk [vmem:[#allocation3 + $0x18] sm:$0xff] %vm1221_vm5, %v952_v61  ;;  %v2960_v0 = vmax.f32 %v2951_v60, %v920_v62  ;;  %1030 = vperm.xlu1 %2208, %v952_v61   ;;  %v968_v35 = vsub.f32 %v2946_v57, %v952_v61  ;;  %v981_v41 = vmul.f32 1.442695, %v965_v25  ;;  %v914_v61 = vld [vmem:[#allocation3 + $0x68] sm:$0xff]  ;;  %v1256_v62 = vld [vmem:[%s3367_s16] sm:$0xff] }
 0x34c   : > { %1239 = vst.msk [vmem:[#allocation3 + $0x8] sm:$0xff] %vm1221_vm5, %v2960_v0  ;;  %1265 = vperm.xlu0 %2207, %v1257_v63   ;;  %v987_v53 = vmul.f32 1.442695, %v968_v35  ;;  %2218 = vpow2.f32 %v981_v41  ;;  %v966_v63 = vsub.f32 %v2951_v60, %v2960_v0 }
 0x34d   : > { %v926_v2 = vpop.xlane.xlu0 %925 }
 0x34e   : > { %v2969_v4 = vmax.f32 %v2962_v1, %v926_v2  ;;  %1020 = vperm.xlu1 %2208, %v2960_v0   ;;  %2220 = vpow2.f32 %v987_v53  ;;  %v967_v0 = vsub.f32 %v2941_v52, %v2944_v55  ;;  %v983_v15 = vmul.f32 1.442695, %v966_v63 }
 0x34f   : > { %v932_v5 = vpop.xlane.xlu1 %931 }
 0x350   : > { %1242 = vst.msk [vmem:[#allocation3 + $0x20] sm:$0xff] %vm1221_vm5, %v2969_v4  ;;  %v956_v7 = vmax.f32 %v2966_v3, %v932_v5 }
 0x351   : > { %v930_v8 = vpop.xlane.xlu0 %929 }
 0x352   : > { %1245 = vst.msk [vmem:[#allocation3 + $0x38] sm:$0xff] %vm1221_vm5, %v956_v7  ;;  %v2981_v10 = vmax.f32 %v2972_v6, %v930_v8  ;;  %v972_v57 = vsub.f32 %v2966_v3, %v956_v7 }
 0x353   : > { %v928_v12 = vpop.xlane.xlu1 %927 }
 0x354   : > { %1244 = vst.msk [vmem:[#allocation3 + $0x30] sm:$0xff] %vm1221_vm5, %v2981_v10  ;;  %v954_v14 = vmax.f32 %v2977_v9, %v928_v12  ;;  %1045 = vperm.xlu1 %2208, %v2981_v10  }
 0x355   : > { %v934_v16 = vpop.xlane.xlu0 %933 }
 0x356   : > { %1243 = vst.msk [vmem:[#allocation3 + $0x28] sm:$0xff] %vm1221_vm5, %v954_v14  ;;  %v2995_v18 = vmax.f32 %v2985_v13, %v934_v16  ;;  %v970_v8 = vsub.f32 %v2977_v9, %v954_v14  ;;  %v985_v9 = vmul.f32 1.442695, %v967_v0 }
 0x357   : > { %v940_v21 = vpop.xlane.xlu1 %939 }
 0x358   : > { %1246 = vst.msk [vmem:[#allocation3 + $0x40] sm:$0xff] %vm1221_vm5, %v2995_v18  ;;  %v960_v27 = vmax.f32 %v2991_v17, %v940_v21  ;;  %1035 = vperm.xlu1 %2208, %v2969_v4   ;;  %v991_v16 = vmul.f32 1.442695, %v970_v8 }
 0x359   : > { %v938_v30 = vpop.xlane.xlu0 %937  ;;  %v3054_v55 = vpop.eup %2218 }
 0x35a   : > { %1249 = vst.msk [vmem:[#allocation3 + $0x58] sm:$0xff] %vm1221_vm5, %v960_v27  ;;  %v3007_v33 = vmax.f32 %v2999_v23, %v938_v30  ;;  %v976_v21 = vsub.f32 %v2991_v17, %v960_v27  ;;  %v971_v17 = vsub.f32 %v2972_v6, %v2981_v10  ;;  %v973_v10 = vsub.f32 %v2985_v13, %v2995_v18 }
 0x35b   : > { %v936_v37 = vpop.xlane.xlu1 %935 }
 0x35c   : > { %1248 = vst.msk [vmem:[#allocation3 + $0x50] sm:$0xff] %vm1221_vm5, %v3007_v33  ;;  %v958_v43 = vmax.f32 %v910_v32, %v936_v37  ;;  %1050 = vperm.xlu1 %2208, %v956_v7   ;;  %v995_v7 = vmul.f32 1.442695, %v972_v57  ;;  %v1003_v25 = vmul.f32 1.442695, %v976_v21 }
 0x35d   : > { %v942_v45 = vpop.xlane.xlu0 %941  ;;  %v993_v30 = vmul.f32 1.442695, %v971_v17 }
 0x35e   : > { %1247 = vst.msk [vmem:[#allocation3 + $0x48] sm:$0xff] %vm1221_vm5, %v958_v43  ;;  %v3018_v49 = vmax.f32 %v3010_v39, %v942_v45  ;;  %1060 = vperm.xlu0 %2207, %v958_v43   ;;  %2222 = vpow2.f32 %v995_v7  ;;  %v974_v52 = vsub.f32 %v910_v32, %v958_v43  ;;  %v975_v32 = vsub.f32 %v2999_v23, %v3007_v33 }
 0x35f   : > { %v948_v54 = vpop.xlane.xlu1 %947  ;;  %2224 = vpow2.f32 %v983_v15 }
 0x360   : > { %1250 = vst.msk [vmem:[#allocation3 + $0x60] sm:$0xff] %vm1221_vm5, %v3018_v49  ;;  %v3026_v58 = vmax.f32 %v3014_v47, %v948_v54  ;;  %1040 = vperm.xlu1 %2208, %v954_v14   ;;  %v969_v14 = vsub.f32 %v2962_v1, %v2969_v4  ;;  %2226 = vpow2.f32 %v991_v16  ;;  %v999_v1 = vmul.f32 1.442695, %v974_v52 }
 0x361   : > { %v946_v59 = vpop.xlane.xlu0 %945  ;;  %2228 = vpow2.f32 %v985_v9  ;;  %v1001_v37 = vmul.f32 1.442695, %v975_v32  ;;  %v977_v43 = vsub.f32 %v3010_v39, %v3018_v49 }
 0x362   : > { %v980_v2 = vsub.f32 %v3014_v47, %v3026_v58  ;;  %1253 = vst.msk [vmem:[#allocation3 + $0x78] sm:$0xff] %vm1221_vm5, %v3026_v58  ;;  %v3038_v3 = vmax.f32 %v3020_v56, %v946_v59  ;;  %1070 = vperm.xlu0 %2207, %v960_v27   ;;  %v989_v28 = vmul.f32 1.442695, %v969_v14  ;;  %v3059_v27 = vpop.eup %2220  ;;  %2230 = vpow2.f32 %v1003_v25 }
 0x363   : > { %v944_v5 = vpop.xlane.xlu1 %943 }
 0x364   : > { %v979_v12 = vsub.f32 %v3020_v56, %v3038_v3  ;;  %1252 = vst.msk [vmem:[#allocation3 + $0x70] sm:$0xff] %vm1221_vm5, %v3038_v3  ;;  %v962_v60 = vmax.f32 %v914_v61, %v944_v5  ;;  %1260 = vperm.xlu1 %2208, %v1256_v62   ;;  %2232 = vpow2.f32 %v989_v28 }
 0x365   : > { %2234 = vpow2.f32 %v999_v1 }
 0x366   : > { %1251 = vst.msk [vmem:[#allocation3 + $0x68] sm:$0xff] %vm1221_vm5, %v962_v60  ;;  %1080 = vperm.xlu0 %2207, %v962_v60   ;;  %v978_v4 = vsub.f32 %v914_v61, %v962_v60  ;;  %2236 = vpow2.f32 %v993_v30 }
 0x368   : > { %1055 = vperm.xlu1 %2208, %v2995_v18   ;;  %v1007_v35 = vmul.f32 1.442695, %v978_v4  ;;  %v1005_v18 = vmul.f32 1.442695, %v977_v43 }
 0x36a   : > { %1090 = vperm.xlu0 %2207, %v3026_v58   ;;  %2238 = vpow2.f32 %v1007_v35 }
 0x36b   : > { %v3066_v6 = vpop.eup %2222  ;;  %2240 = vpow2.f32 %v1001_v37 }
 0x36c   : > { %1065 = vperm.xlu1 %2208, %v3007_v33   ;;  %v3071_v41 = vpop.eup %2224  ;;  %v997_v33 = vmul.f32 1.442695, %v973_v10 }
 0x36d   : > { %v3074_v23 = vpop.eup %2226 }
 0x36e   : > { %1336 = vperm.xlu0 %2207, %v3054_v55   ;;  %v3079_v45 = vpop.eup %2228  ;;  %2242 = vpow2.f32 %v997_v33 }
 0x36f   : > { %v3082_v13 = vpop.eup %2230  ;;  %2244 = vpow2.f32 %v1005_v18 }
 0x370   : > { %1075 = vperm.xlu1 %2208, %v3018_v49  }
 0x371   : > { %v3085_v53 = vpop.eup %2232 }
 0x372   : > { %1351 = vperm.xlu0 %2207, %v3059_v27   ;;  %v3088_v54 = vpop.eup %2234 }
 0x373   : > { %v3091_v39 = vpop.eup %2236 }
 0x374   : > { %1085 = vperm.xlu1 %2208, %v3038_v3  }
 0x376   : > { %1371 = vperm.xlu0 %2207, %v3066_v6  }
 0x377   : > { %v3094_v49 = vpop.eup %2238 }
 0x378   : > { %1341 = vperm.xlu1 %2208, %v3071_v41   ;;  %v3097_v57 = vpop.eup %2240 }
 0x37a   : > { %1361 = vperm.xlu0 %2207, %v3074_v23  }
 0x37b   : > { %v3100_v59 = vpop.eup %2242 }
 0x37c   : > { %1346 = vperm.xlu1 %2208, %v3079_v45   ;;  %v3103_v61 = vpop.eup %2244 }
 0x37e   : > { %1391 = vperm.xlu0 %2207, %v3082_v13  }
 0x380   : > { %1356 = vperm.xlu1 %2208, %v3085_v53  }
 0x382   : > { %1381 = vperm.xlu0 %2207, %v3088_v54  }
 0x384   : > { %1366 = vperm.xlu1 %2208, %v3091_v39  }
 0x386   : > { %1401 = vperm.xlu0 %2207, %v3094_v49  }
 0x388   : > { %1386 = vperm.xlu1 %2208, %v3097_v57  }
 0x38c   : > { %1376 = vperm.xlu1 %2208, %v3100_v59  }
 0x390   : > { %1396 = vperm.xlu1 %2208, %v3103_v61  }
 0x3c1   : > { %v1026_v62 = vpop.permute.xlu1 %1025 }
 0x3c2   : > { %v1095_v63 = vsub.f32 %v2893_v20, %v1026_v62 }
 0x3c3   : > { %v1016_v5 = vpop.permute.xlu0 %1015 }
 0x3c4   : > { %v1113_v7 = vmul.f32 1.442695, %v1095_v63  ;;  %v1093_v8 = vsub.f32 %v2895_v22, %v1016_v5 }
 0x3c5   : > { %v1031_v60 = vpop.permute.xlu1 %1030 }
 0x3c6   : > { %2246 = vpow2.f32 %v1113_v7  ;;  %v1109_v0 = vmul.f32 1.442695, %v1093_v8  ;;  %v1096_v15 = vsub.f32 %v2898_v24, %v1031_v60 }
 0x3c7   : > { %v1266_v22 = vpop.permute.xlu0 %1265 }
 0x3c8   : > { %2248 = vpow2.f32 %v1109_v0  ;;  %v1115_v16 = vmul.f32 1.442695, %v1096_v15 }
 0x3c9   : > { %v1021_v21 = vpop.permute.xlu1 %1020 }
 0x3ca   : > { %v1094_v9 = vsub.f32 %v2901_v26, %v1021_v21  ;;  %2250 = vpow2.f32 %v1115_v16 }
 0x3cc   : > { %v1111_v14 = vmul.f32 1.442695, %v1094_v9 }
 0x3ce   : > { %2252 = vpow2.f32 %v1111_v14 }
 0x3cf   : > { %v1046_v25 = vpop.permute.xlu1 %1045 }
 0x3d0   : > { %v1099_v20 = vsub.f32 %v2910_v34, %v1046_v25 }
 0x3d2   : > { %v1121_v52 = vmul.f32 1.442695, %v1099_v20 }
 0x3d3   : > { %v2247_v28 = vpop.eup %2246  ;;  %v1036_v17 = vpop.permute.xlu1 %1035 }
 0x3d4   : > { %2254 = vpow2.f32 %v1121_v52  ;;  %v1097_v1 = vsub.f32 %v2905_v29, %v1036_v17  ;;  %1177 = vadd.xlane.f32.xlu0 %v2247_v28 }
 0x3d5   : > { %v2249_v24 = vpop.eup %2248 }
 0x3d6   : > { %v1117_v4 = vmul.f32 1.442695, %v1097_v1  ;;  %1173 = vadd.xlane.f32.xlu1 %v2249_v24 }
 0x3d7   : > { %v1051_v30 = vpop.permute.xlu1 %1050  ;;  %v2251_v32 = vpop.eup %2250 }
 0x3d8   : > { %2256 = vpow2.f32 %v1117_v4  ;;  %v1100_v26 = vsub.f32 %v2907_v31, %v1051_v30  ;;  %v1314_v31 = vadd.f32 %v2997_v19, %v1266_v22 }
 0x3d9   : > { %v1061_v35 = vpop.permute.xlu0 %1060 }
 0x3da   : > { %v1123_v10 = vmul.f32 1.442695, %v1100_v26  ;;  %1179 = vadd.xlane.f32.xlu1 %v2251_v32  ;;  %v1102_v63 = vsub.f32 %v2925_v44, %v1061_v35 }
 0x3db   : > { %v2253_v34 = vpop.eup %2252  ;;  %v1041_v37 = vpop.permute.xlu1 %1040 }
 0x3dc   : > { %2258 = vpow2.f32 %v1123_v10  ;;  %v1098_v33 = vsub.f32 %v2913_v36, %v1041_v37  ;;  %1175 = vadd.xlane.f32.xlu0 %v2253_v34  ;;  %v1430_v43 = vpack.c.bf16 %v2253_v34, %v2249_v24  ;;  %v1127_v36 = vmul.f32 1.442695, %v1102_v63 }
 0x3dd   : > { %v1071_v29 = vpop.permute.xlu0 %1070 }
 0x3de   : > { %v1119_v18 = vmul.f32 1.442695, %v1098_v33  ;;  %v1104_v62 = vsub.f32 %v2919_v40, %v1071_v29  ;;  %2053 = vmatprep.mubr.bf16.mxu0 %v1430_v43  ;;  %v1009_v29 = vmul.f32 1.442695, %v979_v12 }
 0x3df   : > { %v1261_v5 = vpop.permute.xlu1 %1260 }
 0x3e0   : > { %2260 = vpow2.f32 %v1119_v18  ;;  %v1131_v7 = vmul.f32 1.442695, %v1104_v62  ;;  %v1311_v8 = vadd.f32 %v2983_v11, %v1261_v5  ;;  %v1011_v5 = vmul.f32 1.442695, %v980_v2 }
 0x3e1   : > { %v2255_v60 = vpop.eup %2254  ;;  %v1081_v0 = vpop.permute.xlu0 %1080 }
 0x3e2   : > { %v1317_v15 = vpack.c.bf16 %v1314_v31, %v1311_v8  ;;  %1185 = vadd.xlane.f32.xlu0 %v2255_v60  ;;  %2262 = vpow2.f32 %v1131_v7  ;;  %v1106_v11 = vsub.f32 %v2937_v51, %v1081_v0 }
 0x3e3   : > { %v1056_v16 = vpop.permute.xlu1 %1055  ;;  %2264 = vpow2.f32 %v1127_v36 }
 0x3e4   : > { %v1101_v21 = vsub.f32 %v2916_v38, %v1056_v16  ;;  %2051 = vmatprep.subr.bf16.mxu0 %v1317_v15  ;;  %v1431_v38 = vpack.c.bf16 %v2251_v32, %v2247_v28  ;;  %v1135_v22 = vmul.f32 1.442695, %v1106_v11 }
 0x3e5   : > { %v2257_v40 = vpop.eup %2256  ;;  %2052 = vmatpush3.bf16.xpose.msra.mxu0 %v1317_v15  ;;  %v1091_v44 = vpop.permute.xlu0 %1090 }
 0x3e6   : > { %v1125_v9 = vmul.f32 1.442695, %v1101_v21  ;;  %v1108_v19 = vsub.f32 %v2931_v48, %v1091_v44  ;;  %1181 = vadd.xlane.f32.xlu0 %v2257_v40 }
 0x3e7   : > { %v1066_v14 = vpop.permute.xlu1 %1065 }
 0x3e8   : > { %2266 = vpow2.f32 %v1125_v9  ;;  %v1139_v25 = vmul.f32 1.442695, %v1108_v19  ;;  %v1103_v20 = vsub.f32 %v2922_v42, %v1066_v14  ;;  %v1141_v9 = vld [vmem:[#allocation4] sm:$0xff] }
 0x3e9   : > { %v2259_v52 = vpop.eup %2258  ;;  %v3136_v3 = vpop.permute.xlu0 %1336 }
 0x3ea   : > { %v1129_v17 = vmul.f32 1.442695, %v1103_v20  ;;  %1187 = vadd.xlane.f32.xlu1 %v2259_v52  ;;  %2268 = vpow2.f32 %v1139_v25  ;;  %v1433_v28 = vpack.c.bf16 %v2259_v52, %v2255_v60  ;;  %v1157_v25 = vmul.f32 %v3054_v55, %v1141_v9  ;;  %v1144_v52 = vld [vmem:[#allocation4 + $0x18] sm:$0xff] }
 0x3eb   : > { %v1076_v1 = vpop.permute.xlu1 %1075 }
 0x3ec   : > { %2270 = vpow2.f32 %v1129_v17  ;;  %v1105_v24 = vsub.f32 %v2928_v46, %v1076_v1  ;;  %2054 = vmatmul.mubr.bf16.vlgmr.msra.gmra.mxu0 %v1431_v38  ;;  %v1142_v38 = vld [vmem:[#allocation4 + $0x8] sm:$0xff] }
 0x3ed   : > { %v2261_v48 = vpop.eup %2260  ;;  %2272 = vpow2.f32 %v1135_v22  ;;  %v3140_v7 = vpop.permute.xlu0 %1351  ;;  %v1160_v22 = vmul.f32 %v3059_v27, %v1144_v52 }
 0x3ee   : > { %v1133_v4 = vmul.f32 1.442695, %v1105_v24  ;;  %1183 = vadd.xlane.f32.xlu1 %v2261_v48  ;;  %v1432_v51 = vpack.c.bf16 %v2261_v48, %v2257_v40  ;;  %v1143_v40 = vld [vmem:[#allocation4 + $0x10] sm:$0xff]  ;;  %v1158_v48 = vmul.f32 %v3071_v41, %v1142_v38 }
 0x3ef   : > { %v1086_v30 = vpop.permute.xlu1 %1085  ;;  %v2263_v26 = vpop.eup %2262  ;;  %v1159_v19 = vmul.f32 %v3079_v45, %v1143_v40 }
 0x3f0   : > { %2274 = vpow2.f32 %v1133_v4  ;;  %v1107_v42 = vsub.f32 %v2934_v50, %v1086_v30  ;;  %2057 = vmatprep.mubr.bf16.mxu0 %v1432_v51  ;;  %v2265_v32 = vpop.eup %2264  ;;  %v1147_v51 = vld [vmem:[#allocation4 + $0x30] sm:$0xff] }
 0x3f1   : > { %v3144_v60 = vpop.permute.xlu0 %1371  ;;  %v1163_v55 = vmul.f32 %v3091_v39, %v1147_v51  ;;  %v1320_v51 = vld [vmem:[#allocation5 + $0x10] sm:$0xff] }
 0x3f2   : > { %v1137_v35 = vmul.f32 1.442695, %v1107_v42  ;;  %1195 = vadd.xlane.f32.xlu1 %v2263_v26  ;;  %v1145_v42 = vld [vmem:[#allocation4 + $0x20] sm:$0xff] }
 0x3f3   : > { %v3138_v12 = vpop.permute.xlu1 %1341  ;;  %v1161_v27 = vmul.f32 %v3085_v53, %v1145_v42  ;;  %v1321_v42 = vld [vmem:[#allocation5 + $0x18] sm:$0xff] }
 0x3f4   : > { %2276 = vpow2.f32 %v1137_v35  ;;  %2058 = vmatmul.mubr.bf16.gmra.mxu0 %v1433_v28  ;;  %v1148_v28 = vld [vmem:[#allocation4 + $0x38] sm:$0xff] }
 0x3f5   : > { %v2267_v10 = vpop.eup %2266  ;;  %2278 = vpow2.f32 %v1009_v29  ;;  %v3148_v58 = vpop.permute.xlu0 %1361  ;;  %v1164_v41 = vmul.f32 %v3066_v6, %v1148_v28  ;;  %v1150_v29 = vld [vmem:[#allocation4 + $0x48] sm:$0xff] }
 0x3f6   : > { %1191 = vadd.xlane.f32.xlu1 %v2265_v32  ;;  %v1434_v46 = vpack.c.bf16 %v2265_v32, %v2267_v10  ;;  %2280 = vpow2.f32 %v1011_v5  ;;  %v1166_v6 = vmul.f32 %v3088_v54, %v1150_v29  ;;  %v1151_v5 = vld [vmem:[#allocation4 + $0x50] sm:$0xff] }
 0x3f7   : > { %v2269_v34 = vpop.eup %2268  ;;  %v3142_v8 = vpop.permute.xlu1 %1346  ;;  %v1167_v9 = vmul.f32 %v3097_v57, %v1151_v5  ;;  %v1326_v5 = vld [vmem:[#allocation5 + $0x40] sm:$0xff] }
 0x3f8   : > { %2061 = vmatprep.mubr.bf16.mxu0 %v1434_v46  ;;  %v1146_v46 = vld [vmem:[#allocation4 + $0x28] sm:$0xff] }
 0x3f9   : > { %v2271_v37 = vpop.eup %2270  ;;  %v3152_v0 = vpop.permute.xlu0 %1391  ;;  %v1162_v39 = vmul.f32 %v3074_v23, %v1146_v46 }
 0x3fa   : > { %1193 = vadd.xlane.f32.xlu0 %v2271_v37  ;;  %1203 = vadd.xlane.f32.xlu1 %v2269_v34  ;;  %v1435_v33 = vpack.c.bf16 %v2263_v26, %v2271_v37  ;;  %v2273_v43 = vpop.eup %2272 }
 0x3fb   : > { %v3146_v47 = vpop.permute.xlu1 %1356 }
 0x3fc   : > { %2062 = vmatmul.mubr.bf16.gmra.mxu0 %v1435_v33  ;;  %v1152_v33 = vld [vmem:[#allocation4 + $0x58] sm:$0xff] }
 0x3fd   : > { %v2275_v50 = vpop.eup %2274  ;;  %v3156_v36 = vpop.permute.xlu0 %1381  ;;  %v1168_v53 = vmul.f32 %v3082_v13, %v1152_v33  ;;  %v1154_v13 = vld [vmem:[#allocation4 + $0x68] sm:$0xff]  ;;  %v1325_v33 = vld [vmem:[#allocation5 + $0x38] sm:$0xff] }
 0x3fe   : > { %1189 = vadd.xlane.f32.xlu0 %v2267_v10  ;;  %1199 = vadd.xlane.f32.xlu1 %v2273_v43  ;;  %v1436_v18 = vpack.c.bf16 %v2273_v43, %v2275_v50  ;;  %v1170_v54 = vmul.f32 %v3094_v49, %v1154_v13  ;;  %v1327_v13 = vld [vmem:[#allocation5 + $0x48] sm:$0xff] }
 0x3ff   : > { %v3150_v2 = vpop.permute.xlu1 %1366 }
 0x400   : > { %2065 = vmatprep.mubr.bf16.mxu0 %v1436_v18 }
 0x401   : > { %v2277_v62 = vpop.eup %2276  ;;  %v3160_v21 = vpop.permute.xlu0 %1401 }
 0x402   : > { %1201 = vadd.xlane.f32.xlu0 %v2277_v62  ;;  %v1437_v63 = vpack.c.bf16 %v2269_v34, %v2277_v62  ;;  %v3130_v31 = vpop.eup %2278 }
 0x403   : > { %v3133_v56 = vpop.eup %2280  ;;  %v3154_v15 = vpop.permute.xlu1 %1386 }
 0x404   : > { %2066 = vmatmul.mubr.bf16.gmra.mxu0 %v1437_v63  ;;  %v1156_v63 = vld [vmem:[#allocation4 + $0x78] sm:$0xff] }
 0x405   : > { %v1172_v23 = vmul.f32 %v3133_v56, %v1156_v63 }
 0x406   : > { %1197 = vadd.xlane.f32.xlu0 %v2275_v50 }
 0x407   : > { %v3158_v16 = vpop.permute.xlu1 %1376 }
 0x40b   : > { %v3162_v44 = vpop.permute.xlu1 %1396 }
 0x40f   : > { %1406 = vperm.xlu1 %2208, %v3130_v31  }
 0x41c   : > { %1411 = vperm.xlu0 %2207, %v3133_v56  }
 0x45d   : > { %v1178_v11 = vpop.xlane.xlu0 %1177 }
 0x45e   : > { %v1207_v14 = vadd.f32 %v1178_v11, %v1159_v19 }
 0x45f   : > { %v1174_v20 = vpop.xlane.xlu1 %1173 }
 0x460   : > { %1224 = vst.msk [vmem:[#allocation4 + $0x10] sm:$0xff] %vm1221_vm5, %v1207_v14  ;;  %v1205_v17 = vadd.f32 %v1174_v20, %v1157_v25  ;;  %v1149_v14 = vld [vmem:[#allocation4 + $0x40] sm:$0xff] }
 0x461   : > { %v1165_v52 = vmul.f32 %v3100_v59, %v1149_v14 }
 0x462   : > { %1222 = vst.msk [vmem:[#allocation4] sm:$0xff] %vm1221_vm5, %v1205_v17 }
 0x463   : > { %v1180_v1 = vpop.xlane.xlu1 %1179 }
 0x464   : > { %v1208_v24 = vadd.f32 %v1180_v1, %v1160_v22  ;;  %v1155_v22 = vld [vmem:[#allocation4 + $0x70] sm:$0xff] }
 0x465   : > { %v1176_v4 = vpop.xlane.xlu0 %1175  ;;  %v1171_v57 = vmul.f32 %v3130_v31, %v1155_v22 }
 0x466   : > { %1225 = vst.msk [vmem:[#allocation4 + $0x18] sm:$0xff] %vm1221_vm5, %v1208_v24  ;;  %v1206_v45 = vadd.f32 %v1176_v4, %v1158_v48  ;;  %v1153_v48 = vld [vmem:[#allocation4 + $0x60] sm:$0xff] }
 0x467   : > { %v1169_v49 = vmul.f32 %v3103_v61, %v1153_v48 }
 0x468   : > { %1223 = vst.msk [vmem:[#allocation4 + $0x8] sm:$0xff] %vm1221_vm5, %v1206_v45 }
 0x46b   : > { %v1186_v30 = vpop.xlane.xlu0 %1185 }
 0x46c   : > { %v1211_v26 = vadd.f32 %v1186_v30, %v1163_v55  ;;  %v1318_v55 = vld [vmem:[#allocation5] sm:$0xff]  ;;  %v1416_v30 = vmul.f32 %v3142_v8, %v1320_v51 }
 0x46d   : > { %v1322_v8 = vld [vmem:[#allocation5 + $0x20] sm:$0xff] }
 0x46e   : > { %1228 = vst.msk [vmem:[#allocation4 + $0x30] sm:$0xff] %vm1221_vm5, %v1211_v26 }
 0x46f   : > { %v1182_v35 = vpop.xlane.xlu0 %1181 }
 0x470   : > { %v1209_v32 = vadd.f32 %v1182_v35, %v1161_v27  ;;  %v1414_v27 = vmul.f32 %v3136_v3, %v1318_v55  ;;  %v1319_v35 = vld [vmem:[#allocation5 + $0x8] sm:$0xff] }
 0x471   : > { %v1415_v46 = vmul.f32 %v3138_v12, %v1319_v35  ;;  %v1421_v12 = vmul.f32 %v3144_v60, %v1325_v33  ;;  %v1422_v60 = vmul.f32 %v3158_v16, %v1326_v5 }
 0x472   : > { %1226 = vst.msk [vmem:[#allocation4 + $0x20] sm:$0xff] %vm1221_vm5, %v1209_v32  ;;  %v1417_v32 = vmul.f32 %v3140_v7, %v1321_v42  ;;  %v1418_v7 = vmul.f32 %v3146_v47, %v1322_v8 }
 0x473   : > { %v1188_v10 = vpop.xlane.xlu1 %1187 }
 0x474   : > { %v1212_v34 = vadd.f32 %v1188_v10, %v1164_v41  ;;  %v1324_v41 = vld [vmem:[#allocation5 + $0x30] sm:$0xff] }
 0x476   : > { %1229 = vst.msk [vmem:[#allocation4 + $0x38] sm:$0xff] %vm1221_vm5, %v1212_v34 }
 0x477   : > { %v1184_v37 = vpop.xlane.xlu1 %1183 }
 0x478   : > { %v1210_v43 = vadd.f32 %v1184_v37, %v1162_v39  ;;  %v1420_v37 = vmul.f32 %v3150_v2, %v1324_v41 }
 0x47a   : > { %1227 = vst.msk [vmem:[#allocation4 + $0x28] sm:$0xff] %vm1221_vm5, %v1210_v43 }
 0x47b   : > { %v1196_v50 = vpop.xlane.xlu1 %1195 }
 0x47c   : > { %v1216_v18 = vadd.f32 %v1196_v50, %v1168_v53  ;;  %v1323_v50 = vld [vmem:[#allocation5 + $0x28] sm:$0xff] }
 0x47d   : > { %v1419_v2 = vmul.f32 %v3148_v58, %v1323_v50 }
 0x47e   : > { %1233 = vst.msk [vmem:[#allocation4 + $0x58] sm:$0xff] %vm1221_vm5, %v1216_v18 }
 0x47f   : > { %v1192_v62 = vpop.xlane.xlu1 %1191 }
 0x480   : > { %v1214_v40 = vadd.f32 %v1192_v62, %v1166_v6  ;;  %v1328_v6 = vld [vmem:[#allocation5 + $0x50] sm:$0xff] }
 0x481   : > { %v1424_v47 = vmul.f32 %v3154_v15, %v1328_v6 }
 0x482   : > { %1231 = vst.msk [vmem:[#allocation4 + $0x48] sm:$0xff] %vm1221_vm5, %v1214_v40 }
 0x483   : > { %v1204_v19 = vpop.xlane.xlu1 %1203  ;;  %v1194_v11 = vpop.xlane.xlu0 %1193 }
 0x484   : > { %v1220_v25 = vadd.f32 %v1204_v19, %v1172_v23  ;;  %v1215_v20 = vadd.f32 %v1194_v11, %v1167_v9  ;;  %v1329_v9 = vld [vmem:[#allocation5 + $0x58] sm:$0xff] }
 0x485   : > { %v1425_v58 = vmul.f32 %v3152_v0, %v1329_v9 }
 0x486   : > { %1237 = vst.msk [vmem:[#allocation4 + $0x78] sm:$0xff] %vm1221_vm5, %v1220_v25  ;;  %1232 = vst.msk [vmem:[#allocation4 + $0x50] sm:$0xff] %vm1221_vm5, %v1215_v20  ;;  %v1332_v20 = vld [vmem:[#allocation5 + $0x70] sm:$0xff] }
 0x487   : > { %v1200_v17 = vpop.xlane.xlu1 %1199  ;;  %v1190_v38 = vpop.xlane.xlu0 %1189 }
 0x488   : > { %v1218_v56 = vadd.f32 %v1200_v17, %v1170_v54  ;;  %v1213_v1 = vadd.f32 %v1190_v38, %v1165_v52  ;;  %v1423_v52 = vmul.f32 %v3156_v36, %v1327_v13  ;;  %v1330_v38 = vld [vmem:[#allocation5 + $0x60] sm:$0xff] }
 0x48a   : > { %1235 = vst.msk [vmem:[#allocation4 + $0x68] sm:$0xff] %vm1221_vm5, %v1218_v56  ;;  %1230 = vst.msk [vmem:[#allocation4 + $0x40] sm:$0xff] %vm1221_vm5, %v1213_v1  ;;  %v1333_v1 = vld [vmem:[#allocation5 + $0x78] sm:$0xff] }
 0x48b   : > { %v1202_v24 = vpop.xlane.xlu0 %1201  ;;  %v1407_v54 = vpop.permute.xlu1 %1406 }
 0x48c   : > { %v1219_v4 = vadd.f32 %v1202_v24, %v1171_v57  ;;  %v1428_v22 = vmul.f32 %v1407_v54, %v1332_v20  ;;  %v1426_v24 = vmul.f32 %v3162_v44, %v1330_v38 }
 0x48e   : > { %1236 = vst.msk [vmem:[#allocation4 + $0x70] sm:$0xff] %vm1221_vm5, %v1219_v4  ;;  %v1331_v4 = vld [vmem:[#allocation5 + $0x68] sm:$0xff] }
 0x48f   : > { %v1198_v45 = vpop.xlane.xlu0 %1197  ;;  %v1427_v51 = vmul.f32 %v3160_v21, %v1331_v4 }
 0x490   : > { %v1217_v59 = vadd.f32 %v1198_v45, %v1169_v49 }
 0x492   : > { %1234 = vst.msk [vmem:[#allocation4 + $0x60] sm:$0xff] %vm1221_vm5, %v1217_v59 }
 0x497   : > { %v1412_v57 = vpop.permute.xlu0 %1411 }
 0x498   : > { %v1429_v36 = vmul.f32 %v1412_v57, %v1333_v1 }
 0x4ac   : > { %v2055_v26 = vpop.f32.mrf.mxu0 }
 0x4ad   : > { %v1537_v31 = vadd.f32 %v2055_v26, %v1416_v30 }
 0x4ae   : > { %v1472_v28 = vpop.f32.mrf.mxu0 }
 0x4af   : > { %1553 = vst.msk [vmem:[#allocation5 + $0x10] sm:$0xff] %vm692_vm4, %v1537_v31  ;;  %v1535_v61 = vadd.f32 %v1472_v28, %v1414_v27 }
 0x4b0   : > { %v2056_v10 = vpop.f32.mrf.mxu0 }
 0x4b1   : > { %1551 = vst.msk [vmem:[#allocation5] sm:$0xff] %vm692_vm4, %v1535_v61  ;;  %v1538_v34 = vadd.f32 %v2056_v10, %v1417_v32 }
 0x4b2   : > { %v1475_v39 = vpop.f32.mrf.mxu0 }
 0x4b3   : > { %1554 = vst.msk [vmem:[#allocation5 + $0x18] sm:$0xff] %vm692_vm4, %v1538_v34  ;;  %v1536_v3 = vadd.f32 %v1475_v39, %v1415_v46 }
 0x4b4   : > { %v2059_v43 = vpop.f32.mrf.mxu0 }
 0x4b5   : > { %1552 = vst.msk [vmem:[#allocation5 + $0x8] sm:$0xff] %vm692_vm4, %v1536_v3  ;;  %v1541_v53 = vadd.f32 %v2059_v43, %v1420_v37 }
 0x4b6   : > { %v1488_v29 = vpop.f32.mrf.mxu0 }
 0x4b7   : > { %1557 = vst.msk [vmem:[#allocation5 + $0x30] sm:$0xff] %vm692_vm4, %v1541_v53  ;;  %v1539_v18 = vadd.f32 %v1488_v29, %v1418_v7 }
 0x4b8   : > { %v2060_v62 = vpop.f32.mrf.mxu0 }
 0x4b9   : > { %1555 = vst.msk [vmem:[#allocation5 + $0x20] sm:$0xff] %vm692_vm4, %v1539_v18  ;;  %v1542_v63 = vadd.f32 %v2060_v62, %v1421_v12 }
 0x4ba   : > { %v1491_v40 = vpop.f32.mrf.mxu0 }
 0x4bb   : > { %1558 = vst.msk [vmem:[#allocation5 + $0x38] sm:$0xff] %vm692_vm4, %v1542_v63  ;;  %v1540_v23 = vadd.f32 %v1491_v40, %v1419_v2 }
 0x4bc   : > { %v2063_v19 = vpop.f32.mrf.mxu0 }
 0x4bd   : > { %1556 = vst.msk [vmem:[#allocation5 + $0x28] sm:$0xff] %vm692_vm4, %v1540_v23  ;;  %v1545_v11 = vadd.f32 %v2063_v19, %v1424_v47 }
 0x4be   : > { %v1504_v14 = vpop.f32.mrf.mxu0 }
 0x4bf   : > { %1561 = vst.msk [vmem:[#allocation5 + $0x50] sm:$0xff] %vm692_vm4, %v1545_v11  ;;  %v1543_v25 = vadd.f32 %v1504_v14, %v1422_v60 }
 0x4c0   : > { %v2064_v15 = vpop.f32.mrf.mxu0 }
 0x4c1   : > { %1559 = vst.msk [vmem:[#allocation5 + $0x40] sm:$0xff] %vm692_vm4, %v1543_v25  ;;  %v1546_v17 = vadd.f32 %v2064_v15, %v1425_v58 }
 0x4c2   : > { %v1507_v16 = vpop.f32.mrf.mxu0 }
 0x4c3   : > { %1562 = vst.msk [vmem:[#allocation5 + $0x58] sm:$0xff] %vm692_vm4, %v1546_v17  ;;  %v1544_v56 = vadd.f32 %v1507_v16, %v1423_v52 }
 0x4c4   : > { %v2067_v0 = vpop.f32.mrf.mxu0 }
 0x4c5   : > { %1560 = vst.msk [vmem:[#allocation5 + $0x48] sm:$0xff] %vm692_vm4, %v1544_v56  ;;  %v1549_v48 = vadd.f32 %v2067_v0, %v1428_v22 }
 0x4c6   : > { %v1520_v49 = vpop.f32.mrf.mxu0 }
 0x4c7   : > { %1565 = vst.msk [vmem:[#allocation5 + $0x70] sm:$0xff] %vm692_vm4, %v1549_v48  ;;  %v1547_v45 = vadd.f32 %v1520_v49, %v1426_v24 }
 0x4c8   : > { %v2068_v59 = vpop.f32.mrf.mxu0 }
 0x4c9   : > { %1563 = vst.msk [vmem:[#allocation5 + $0x60] sm:$0xff] %vm692_vm4, %v1547_v45  ;;  %v1550_v55 = vadd.f32 %v2068_v59, %v1429_v36  ;;  %1570 = sbr.rel (%p1950_p7) target bundleno = 1506 (0x5e2), region = 64 }
 0x4ca   : > { %v1523_v30 = vpop.f32.mrf.mxu0 }
 0x4cb   : > { %1566 = vst.msk [vmem:[#allocation5 + $0x78] sm:$0xff] %vm692_vm4, %v1550_v55  ;;  %v1548_v42 = vadd.f32 %v1523_v30, %v1427_v51 }
 0x4cd   : > { %1564 = vst.msk [vmem:[#allocation5 + $0x68] sm:$0xff] %vm692_vm4, %v1548_v42 }
 0x4ce   : > { %v1573_v44 = vld [vmem:[#allocation4 + $0x10] sm:$0xff]  ;;  %v1571_v26 = vld [vmem:[#allocation4] sm:$0xff]  ;;  %v1574_v27 = vld [vmem:[#allocation4 + $0x18] sm:$0xff]  ;;  %v2524_v31 = vmov 0  }
 0x4cf   : > { %2283 = vset.pattern.permute.xlu1 %v2524_v31  ;;  %2282 = vset.pattern.permute.xlu0 %v2524_v31  ;;  %2284 = vrcp.f32 %v1573_v44  ;;  %v1572_v21 = vld [vmem:[#allocation4 + $0x8] sm:$0xff]  ;;  %v1575_v28 = vld [vmem:[#allocation4 + $0x20] sm:$0xff]  ;;  %v1578_v32 = vld [vmem:[#allocation4 + $0x38] sm:$0xff] }
 0x4d0   : > { %2286 = vrcp.f32 %v1571_v26  ;;  %v1576_v35 = vld [vmem:[#allocation4 + $0x28] sm:$0xff]  ;;  %v1577_v61 = vld [vmem:[#allocation4 + $0x30] sm:$0xff]  ;;  %v1579_v10 = vld [vmem:[#allocation4 + $0x40] sm:$0xff] }
 0x4d1   : > { %2288 = vrcp.f32 %v1574_v27  ;;  %v1580_v41 = vld [vmem:[#allocation4 + $0x48] sm:$0xff]  ;;  %v1582_v39 = vld [vmem:[#allocation4 + $0x58] sm:$0xff]  ;;  %v1581_v3 = vld [vmem:[#allocation4 + $0x50] sm:$0xff] }
 0x4d2   : > { %2290 = vrcp.f32 %v1572_v21  ;;  %v1584_v43 = vld [vmem:[#allocation4 + $0x68] sm:$0xff]  ;;  %v1583_v53 = vld [vmem:[#allocation4 + $0x60] sm:$0xff]  ;;  %v1586_v29 = vld [vmem:[#allocation4 + $0x78] sm:$0xff] }
 0x4d3   : > { %2292 = vrcp.f32 %v1576_v35  ;;  %v1585_v18 = vld [vmem:[#allocation4 + $0x70] sm:$0xff]  ;;  %v1603_v9 = vld [vmem:[#allocation5] sm:$0xff]  ;;  %v1604_v11 = vld [vmem:[#allocation5 + $0x8] sm:$0xff] }
 0x4d4   : > { %2294 = vrcp.f32 %v1575_v28  ;;  %v1605_v13 = vld [vmem:[#allocation5 + $0x10] sm:$0xff]  ;;  %v1606_v54 = vld [vmem:[#allocation5 + $0x18] sm:$0xff]  ;;  %v1607_v17 = vld [vmem:[#allocation5 + $0x20] sm:$0xff] }
 0x4d5   : > { %2296 = vrcp.f32 %v1578_v32  ;;  %v1608_v22 = vld [vmem:[#allocation5 + $0x28] sm:$0xff]  ;;  %v1609_v57 = vld [vmem:[#allocation5 + $0x30] sm:$0xff]  ;;  %v1610_v48 = vld [vmem:[#allocation5 + $0x38] sm:$0xff] }
 0x4d6   : > { %2298 = vrcp.f32 %v1577_v61  ;;  %v1611_v36 = vld [vmem:[#allocation5 + $0x40] sm:$0xff]  ;;  %v1612_v51 = vld [vmem:[#allocation5 + $0x48] sm:$0xff]  ;;  %v1613_v42 = vld [vmem:[#allocation5 + $0x50] sm:$0xff] }
 0x4d7   : > { %2300 = vrcp.f32 %v1580_v41  ;;  %v1614_v27 = vld [vmem:[#allocation5 + $0x58] sm:$0xff]  ;;  %v1615_v35 = vld [vmem:[#allocation5 + $0x60] sm:$0xff]  ;;  %v1616_v61 = vld [vmem:[#allocation5 + $0x68] sm:$0xff] }
 0x4d8   : > { %2302 = vrcp.f32 %v1579_v10 }
 0x4d9   : > { %2304 = vrcp.f32 %v1582_v39  ;;  %v1618_v39 = vld [vmem:[#allocation5 + $0x78] sm:$0xff] }
 0x4da   : > { %2306 = vrcp.f32 %v1581_v3 }
 0x4db   : > { %2308 = vrcp.f32 %v1584_v43  ;;  %v1751_v43 = vld [vmem:[%s2779_s0] sm:$0xff] }
 0x4dc   : > { %v2285_v46 = vpop.eup %2284  ;;  %2310 = vrcp.f32 %v1583_v53 }
 0x4dd   : > { %v2287_v34 = vpop.eup %2286  ;;  %1631 = vperm.xlu1 %2283, %v2285_v46   ;;  %2312 = vrcp.f32 %v1586_v29  ;;  %v1617_v46 = vld [vmem:[#allocation5 + $0x70] sm:$0xff]  ;;  %v1752_v29 = vld [vmem:[%s2779_s0 + $0x8] sm:$0xff] }
 0x4de   : > { %v2289_v8 = vpop.eup %2288  ;;  %1621 = vperm.xlu0 %2282, %v2287_v34   ;;  %2314 = vrcp.f32 %v1585_v18 }
 0x4df   : > { %v2291_v37 = vpop.eup %2290 }
 0x4e0   : > { %v2293_v33 = vpop.eup %2292 }
 0x4e1   : > { %1636 = vperm.xlu1 %2283, %v2289_v8   ;;  %v2295_v7 = vpop.eup %2294 }
 0x4e2   : > { %1626 = vperm.xlu0 %2282, %v2291_v37   ;;  %v2297_v50 = vpop.eup %2296 }
 0x4e3   : > { %v2299_v12 = vpop.eup %2298 }
 0x4e4   : > { %v2301_v6 = vpop.eup %2300 }
 0x4e5   : > { %1646 = vperm.xlu1 %2283, %v2293_v33   ;;  %v2303_v62 = vpop.eup %2302  ;;  %v1748_v33 = vstv %s1747_s9 }
 0x4e6   : > { %1641 = vperm.xlu0 %2282, %v2295_v7   ;;  %v2305_v2 = vpop.eup %2304 }
 0x4e7   : > { %v2307_v63 = vpop.eup %2306 }
 0x4e8   : > { %v2309_v5 = vpop.eup %2308 }
 0x4e9   : > { %1656 = vperm.xlu1 %2283, %v2297_v50   ;;  %v2311_v40 = vpop.eup %2310 }
 0x4ea   : > { %1651 = vperm.xlu0 %2282, %v2299_v12   ;;  %v2313_v47 = vpop.eup %2312 }
 0x4eb   : > { %v2315_v23 = vpop.eup %2314 }
 0x4ed   : > { %1666 = vperm.xlu1 %2283, %v2301_v6  }
 0x4ee   : > { %1661 = vperm.xlu0 %2282, %v2303_v62  }
 0x4f1   : > { %1676 = vperm.xlu1 %2283, %v2305_v2  }
 0x4f2   : > { %1671 = vperm.xlu0 %2282, %v2307_v63  }
 0x4f5   : > { %1686 = vperm.xlu1 %2283, %v2309_v5  }
 0x4f6   : > { %1681 = vperm.xlu0 %2282, %v2311_v40  }
 0x4f9   : > { %1696 = vperm.xlu1 %2283, %v2313_v47  }
 0x4fa   : > { %1691 = vperm.xlu0 %2282, %v2315_v23  }
 0x558   : > { %v1632_v25 = vpop.permute.xlu1 %1631 }
 0x559   : > { %v1622_v19 = vpop.permute.xlu0 %1621  ;;  %v1701_v20 = vmul.f32 %v1632_v25, %v1605_v13 }
 0x55a   : > { %v1699_v60 = vmul.f32 %v1622_v19, %v1603_v9 }
 0x55c   : > { %1715 = vxpose.xlu0.b32.start [1/16] (narrow) %v1699_v60, 16  ;;  %v1637_v15 = vpop.permute.xlu1 %1636 }
 0x55d   : > { %v1627_v14 = vpop.permute.xlu0 %1626  ;;  %v1702_v52 = vmul.f32 %v1637_v15, %v1606_v54 }
 0x55e   : > { %v1700_v58 = vmul.f32 %v1627_v14, %v1604_v11 }
 0x560   : > { %1716 = vxpose.xlu0.b32.cont [2/16] (narrow) %v1700_v58, 16  ;;  %v1647_v56 = vpop.permute.xlu1 %1646 }
 0x561   : > { %v1642_v38 = vpop.permute.xlu0 %1641  ;;  %v1704_v1 = vmul.f32 %v1647_v56, %v1608_v22 }
 0x562   : > { %v1703_v16 = vmul.f32 %v1642_v38, %v1607_v17 }
 0x564   : > { %1717 = vxpose.xlu0.b32.cont [3/16] (narrow) %v1701_v20, 16  ;;  %v1657_v4 = vpop.permute.xlu1 %1656 }
 0x565   : > { %v1652_v0 = vpop.permute.xlu0 %1651  ;;  %v1706_v49 = vmul.f32 %v1657_v4, %v1610_v48 }
 0x566   : > { %v1705_v24 = vmul.f32 %v1652_v0, %v1609_v57 }
 0x568   : > { %1718 = vxpose.xlu0.b32.cont [4/16] (narrow) %v1702_v52, 16  ;;  %v1667_v55 = vpop.permute.xlu1 %1666 }
 0x569   : > { %v1662_v45 = vpop.permute.xlu0 %1661  ;;  %v1708_v30 = vmul.f32 %v1667_v55, %v1612_v51 }
 0x56a   : > { %v1707_v59 = vmul.f32 %v1662_v45, %v1611_v36 }
 0x56c   : > { %1719 = vxpose.xlu0.b32.cont [5/16] (narrow) %v1703_v16, 16  ;;  %v1677_v31 = vpop.permute.xlu1 %1676 }
 0x56d   : > { %v1672_v44 = vpop.permute.xlu0 %1671  ;;  %v1710_v21 = vmul.f32 %v1677_v31, %v1614_v27 }
 0x56e   : > { %v1709_v26 = vmul.f32 %v1672_v44, %v1613_v42 }
 0x570   : > { %1720 = vxpose.xlu0.b32.cont [6/16] (narrow) %v1704_v1, 16  ;;  %v1687_v41 = vpop.permute.xlu1 %1686 }
 0x571   : > { %v1682_v28 = vpop.permute.xlu0 %1681  ;;  %v1712_v10 = vmul.f32 %v1687_v41, %v1616_v61 }
 0x572   : > { %v1711_v32 = vmul.f32 %v1682_v28, %v1615_v35 }
 0x574   : > { %1721 = vxpose.xlu0.b32.cont [7/16] (narrow) %v1705_v24, 16  ;;  %v1697_v37 = vpop.permute.xlu1 %1696 }
 0x575   : > { %v1692_v34 = vpop.permute.xlu0 %1691  ;;  %v1714_v3 = vmul.f32 %v1697_v37, %v1618_v39 }
 0x576   : > { %v1713_v8 = vmul.f32 %v1692_v34, %v1617_v46 }
 0x578   : > { %1722 = vxpose.xlu0.b32.cont [8/16] (narrow) %v1706_v49, 16 }
 0x57c   : > { %1723 = vxpose.xlu0.b32.cont [9/16] (narrow) %v1707_v59, 16 }
 0x580   : > { %1724 = vxpose.xlu0.b32.cont [10/16] (narrow) %v1708_v30, 16 }
 0x584   : > { %1725 = vxpose.xlu0.b32.cont [11/16] (narrow) %v1709_v26, 16 }
 0x588   : > { %1726 = vxpose.xlu0.b32.cont [12/16] (narrow) %v1710_v21, 16 }
 0x58c   : > { %1727 = vxpose.xlu0.b32.cont [13/16] (narrow) %v1711_v32, 16 }
 0x590   : > { %1728 = vxpose.xlu0.b32.cont [14/16] (narrow) %v1712_v10, 16 }
 0x594   : > { %1729 = vxpose.xlu0.b32.cont [15/16] (narrow) %v1713_v8, 16 }
 0x598   : > { %1730 = vxpose.xlu0.b32.end [16/16] (narrow) %v1714_v3, 16 }
 0x5d8   : > { %v1731_v7 = vpop.trf.xlu0 }
 0x5d9   : > { %v1749_v53 = vmul.f32 %v1748_v33, %v1731_v7 }
 0x5db   : > { %v1753_v50 = vadd.f32 %v1751_v43, %v1749_v53 }
 0x5dc   : > { %v1732_v12 = vpop.trf.xlu0 }
 0x5dd   : > { %1755 = vst [vmem:[%s2793_s19] sm:$0xff] %v1753_v50  ;;  %v1750_v18 = vmul.f32 %v1748_v33, %v1732_v12 }
 0x5df   : > { %v1754_v6 = vadd.f32 %v1752_v29, %v1750_v18 }
 0x5e1   : > { %1756 = vst [vmem:[%s2793_s19 + $0x8] sm:$0xff] %v1754_v6 }
 0x5e2 PF: > { %s3368_s20 = sld [smem:[#allocation18_spill]]  ;;  %s1772_s12 = sshll.u32 %s2793_s19, 4  ;;  %s3234_s12 = int_to_ptr.vmem [resolvable:$true] %s1772_s12 }
 0x5e3   : > { %s3369_s10 = sld [smem:[#allocation17_spill]]  ;;  %s1758_s17 = scalar_lea.sflag [#allocation9], %s2775_s18 }
 0x5e4   : > { %s3370_s25 = sld [smem:[#allocation21_spill]]  ;;  %s2372_s5 = scalar_lea.vmem %s3234_s12, 256 }
 0x5e5   : > { %s3371_s0 = sld [smem:[#allocation27_spill]]  ;;  %p2373_p9 = scmp.ne.s32.totalorder %s3234_s12, %s2372_s5 }
 0x5e6   : > { %s2525_s22 = smov [#allocation12]  }
 0x5e7   : > { %s2376_s9 = sshll.u32 %s2525_s22, 4  ;;  %s2377_s9 = int_to_ptr.vmem [resolvable:$false] %s2376_s9 }
 0x5e8   : > { %s1952_s21 = sshll.u32 %s3368_s20, 2  ;;  %s2378_s19 = scalar_lea.vmem %s2377_s9, 512 }
 0x5e9   : > { %s1769_s23 = sadd.s32 %s3369_s10, %s1952_s21  ;;  %p2379_p12 = scmp.lt.s32.totalorder %s3234_s12, %s2377_s9 }
 0x5ea   : > { %s1953_s7 = sshll.u32 %s1769_s23, 7  ;;  %p3372_p2 = scmp.ne.s32.totalorder %s3370_s25, 0 }
 0x5eb   : > { %s3239_s24 = scalar_lea.hbm %s3371_s0, %s1953_s7  ;;  %p2380_p13 = scmp.lt.s32.totalorder %s2378_s19, %s2372_s5 }
 0x5ec   : > { %p2374_p1 = pnand %p2373_p9, %p3372_p2 }
 0x5ed   : > { %p2381_p11 = por %p2380_p13, %p2379_p12 }
 0x5ee   : > { %p2375_p5 = pneg %p2374_p1 }
 0x5f0   : > { %p2382_p0 = pnand %p2381_p11, %p2375_p5 }
 0x5f2   : > { %2385 = shalt.err (!%p2382_p0)
}
 0x5f3   : > { %s2386_s20 = scalar_lea.hbm %s3239_s24, 256  ;;  %s2390_s23 = scalar_lea.hbm %s3371_s0, 1024 }
 0x5f4   : > { %p2387_p4 = scmp.ne.s32.totalorder %s3239_s24, %s2386_s20  ;;  %p2391_p3 = scmp.lt.s32.totalorder %s3239_s24, %s3371_s0 }
 0x5f5   : > { %p2392_p8 = scmp.lt.s32.totalorder %s2390_s23, %s2386_s20 }
 0x5f6   : > { %p2388_p10 = pnand %p2387_p4, %p3372_p2 }
 0x5f7   : > { %p2393_p7 = por %p2392_p8, %p2391_p3 }
 0x5f8   : > { %p2389_p6 = pneg %p2388_p10 }
 0x5fa   : > { %p2394_p9 = pnand %p2393_p7, %p2389_p6 }
 0x5fc   : > { %2397 = shalt.err (!%p2394_p9)
}
 0x5fd   : > { %s2526_s11 = smov 128   ;;  %s2527_s5 = smov 256  }
 0x5fe   : > { %s2528_s22 = smov 8  }
 0x5ff   : > { %2075 = dma.vmem_to_hbm [thread:$0]  (%p3372_p2), %s3234_s12, 256, %s3239_s24, %s1758_s17, %s2526_s11, %s2527_s5, %s2528_s22  }
 0x600 PF: > { %s3373_s9 = sld [smem:[#allocation16_spill]]  ;;  %p2089_p1 = scmp.ge.s32.totalorder %s2512_s14, 2 }
 0x601   : > { %s3374_s19 = sld [smem:[#allocation22_spill]] }
 0x606   : > { %s1787_s10 = sand.u32 1, %s3373_s9  }
 0x607   : > { %p3375_p5 = scmp.ne.s32.totalorder %s3374_s19, 0  ;;  %s1788_s20 = scalar_lea.sflag [#allocation9], %s1787_s10 }
 0x609   : > { %p2085_p12 = pnand %p2089_p1, %p3375_p5 }
 0x60b   : > { %p2086_p13 = pneg %p2085_p12 }
 0x60d   : > { %2459 = dma.done.wait (%p2086_p13), %s1788_s20, 256  }
 0x60e   : > { %2461 = vsyncadd (%p2086_p13), %s1788_s20, 4294967040  ;;  %s27_s14 = sadd.s32 1, %s2512_s14   ;;  %s3377_s18 = smov %s2757_s29 }
 0x60f   : > { %p3269_p11 = scmp.ge.s32.totalorder %s27_s14, 10   ;;  %s3378_s9 = sld [smem:[#allocation19_spill]] }
 0x610   : > { %s3379_s6 = sld [smem:[#allocation20_spill]]  ;;  %s3382_s25 = smov %s3400_s26 }
 0x611   : > { %s3380_s11 = sld [smem:[#allocation23_spill]]  ;;  %s3383_s26 = smov %s2468_s27 }
 0x612   : > { %s3381_s12 = sld [smem:[#allocation24_spill]]  ;;  %s3384_s27 = smov %s2472_s28 }
 0x613   : > { %s3385_s28 = smov %s2762_s15  ;;  %s3386_s29 = smov %s2480_s30 }
 0x614   : > { %s3387_s30 = smov %s2484_s8  ;;  %s3388_s8 = smov %s3377_s18 }
 0x615   : > { %s3389_s10 = smov %s2508_s13  ;;  %s3390_s13 = smov %s3382_s25 }
 0x616   :  { %26 = sbr.rel (!%p3269_p11) target bundleno = 17 (0x11), region = 114 }
 0x61b   :  { %1793 = vsyncpa [#allocation8], 1 }
 0x61c   :  { %1795 = vsyncpa [#allocation8 + $0x1], 1 }
 0x61d   :  { %1796 = vsyncpa [#allocation11], 1 }
 0x61e   :  { %1798 = vsyncpa [#allocation11 + $0x1], 1 }
 0x61f   :  { %1799 = vsyncpa [#allocation9], 1 }
 0x620   :  { %1801 = vsyncpa [#allocation9 + $0x1], 1 }

</bundles_post_ra>
